<compile_context>
chip_gen: v5e
topology: v5e:2x2
jax: 0.10.0
libtpu: 0.0.40
codegen_flags: <defaults>
</compile_context>

<pallas_src>
import functools
import numpy as np

import jax
import jax.numpy as jnp
from jax.experimental import pallas as pl
from jax.experimental.pallas import tpu as pltpu


# ----------------------------------------------------------------------------
# Pallas kernel: whole PPO update loop's forward pass in one invocation
# ----------------------------------------------------------------------------
def _ppo_fused_kernel(
    packed_ref,        # (TOTAL, OBS+A+4)  [obs | act | oldlp+const | adv | ret | val]
    w1_ref, b1_ref,    # (OBS, 2H), (1, 2H)   fused [actor | critic] layer 1
    w2_ref, b2_ref,    # (2H, 2H), (1, 2H)    block-diagonal layer 2
    w3_ref, b3_ref,    # (2H, A+1), (1, A+1)  block-diagonal layer 3
    inv2v_ref,         # (1, A)               0.5 * exp(-2*logstd)
    seg_ref,           # (S, TOTAL)           segment-sum matrix (minibatch membership)
    segt_ref,          # (TOTAL, S)           its transpose (per-row broadcast)
    out_ref,           # (S, 6)  per-minibatch [v_loss, pg_loss, old_kl, kl, clipfrac, loss_wo_ent]
    *, obs_dim, act_dim, minibatch_size, clip_coef, vf_coef,
    norm_adv, clip_vloss, matmul_dtype,
):
    f32 = jnp.float32
    inv_mb = 1.0 / float(minibatch_size)
    inv_mbm1 = 1.0 / float(minibatch_size - 1)

    packed = packed_ref[...]
    c = obs_dim + act_dim
    obs = packed[:, :obs_dim]
    act = packed[:, obs_dim:c]
    oldlp_adj = packed[:, c:c + 1]       # old_logprob + Gaussian log-prob constant
    adv = packed[:, c + 1:c + 2]
    ret = packed[:, c + 2:c + 3]
    val = packed[:, c + 3:c + 4]

    # ---- fused actor+critic MLP (128-lane matmuls on the full batch) --------
    def mm(a, b):
        return jnp.dot(a.astype(matmul_dtype), b.astype(matmul_dtype),
                       preferred_element_type=f32)

    h = jnp.maximum(mm(obs, w1_ref[...]) + b1_ref[...], 0.0)
    h = jnp.maximum(mm(h, w2_ref[...]) + b2_ref[...], 0.0)
    out3 = mm(h, w3_ref[...]) + b3_ref[...]                  # (TOTAL, A+1)

    action_mean = out3[:, :act_dim]                           # (TOTAL, A)
    newvalue = out3[:, act_dim:act_dim + 1]                   # (TOTAL, 1)

    # ---- diagonal Gaussian log-prob (constants folded into oldlp_adj) -------
    diff = act - action_mean
    sq = jnp.sum(diff * diff * inv2v_ref[...], axis=1, keepdims=True)   # (TOTAL, 1)
    logratio = -sq - oldlp_adj                                # newlogprob - old_logprob
    ratio = jnp.exp(logratio)

    clip_ind = (jnp.abs(ratio - 1.0) > clip_coef).astype(f32)
    vd = newvalue - ret
    v_un = vd * vd
    if clip_vloss:
        vc = val + jnp.clip(newvalue - val, -clip_coef, clip_coef)
        v_cl = (vc - ret) * (vc - ret)
        vmax = jnp.maximum(v_un, v_cl)
    else:
        vmax = v_un

    # ---- pass 1: single MXU segmented reduction over per-sample columns -----
    v1 = jnp.concatenate(
        [-logratio, ratio - 1.0 - logratio, clip_ind, vmax, adv, adv * adv],
        axis=1)                                               # (TOTAL, 6)
    sums = jnp.dot(seg_ref[...], v1, preferred_element_type=f32)   # (S, 6)

    old_kl_mb = sums[:, 0:1] * inv_mb
    kl_mb = sums[:, 1:2] * inv_mb
    clipfrac_mb = sums[:, 2:3] * inv_mb
    vloss_mb = 0.5 * sums[:, 3:4] * inv_mb
    adv_mean_mb = sums[:, 4:5] * inv_mb
    # unbiased (ddof=1) variance via sum-of-squares (matches torch .std())
    adv_var_mb = jnp.maximum(sums[:, 5:6] - minibatch_size * adv_mean_mb * adv_mean_mb,
                             0.0) * inv_mbm1
    adv_std_mb = jnp.sqrt(adv_var_mb)

    if norm_adv:
        inv_std_mb = 1.0 / (adv_std_mb + 1e-8)
        mean_row = jnp.dot(segt_ref[...], adv_mean_mb, preferred_element_type=f32)
        istd_row = jnp.dot(segt_ref[...], inv_std_mb, preferred_element_type=f32)
        adv_n = (adv - mean_row) * istd_row
    else:
        adv_n = adv

    pg1 = -adv_n * ratio
    pg2 = -adv_n * jnp.clip(ratio, 1.0 - clip_coef, 1.0 + clip_coef)
    pgmax = jnp.maximum(pg1, pg2)                             # (TOTAL, 1)

    # ---- pass 2: segmented reduction for the policy-gradient loss -----------
    pg_mb = jnp.dot(seg_ref[...], pgmax, preferred_element_type=f32) * inv_mb  # (S, 1)

    # entropy term is a data-independent constant; added to the loss in wrapper
    loss_wo_ent_mb = pg_mb + vf_coef * vloss_mb

    out_ref[...] = jnp.concatenate(
        [vloss_mb, pg_mb, old_kl_mb, kl_mb, clipfrac_mb, loss_wo_ent_mb], axis=1)


# ----------------------------------------------------------------------------
# One-time fusion of the frozen agent params (hoisted out of the dispatch path)
# ----------------------------------------------------------------------------
def _block_diag(a, b):
    ra, ca = a.shape
    rb, cb = b.shape
    top = jnp.concatenate([a, jnp.zeros((ra, cb), a.dtype)], axis=1)
    bot = jnp.concatenate([jnp.zeros((rb, ca), b.dtype), b], axis=1)
    return jnp.concatenate([top, bot], axis=0)


def fuse_agent_params(params, *, act_dim):
    half_log2pi = 0.5 * float(np.log(2.0 * np.pi))
    logstd = params["logstd"]                                  # (1, A)
    return dict(
        w1=jnp.concatenate([params["aw1"], params["cw1"]], axis=1),   # (OBS, 2H)
        b1=jnp.concatenate([params["ab1"], params["cb1"]], axis=1),
        w2=_block_diag(params["aw2"], params["cw2"]),                  # (2H, 2H)
        b2=jnp.concatenate([params["ab2"], params["cb2"]], axis=1),
        w3=_block_diag(params["aw3"], params["cw3"]),                  # (2H, A+1)
        b3=jnp.concatenate([params["ab3"], params["cb3"]], axis=1),
        inv_2var=0.5 * jnp.exp(-2.0 * logstd),                         # (1, A)
        logp_const=jnp.sum(logstd) + act_dim * half_log2pi,            # scalar
        entropy_sum=jnp.sum(0.5 + half_log2pi + logstd),               # scalar
    )


# ----------------------------------------------------------------------------
# Wrapper: one un-gridded pallas_call + minimal XLA glue (single jit dispatch)
# ----------------------------------------------------------------------------
def make_learner_forward(*, obs_dim, act_dim, hidden, batch_size, minibatch_size,
                         update_epochs, clip_coef, ent_coef, vf_coef,
                         norm_adv, clip_vloss, matmul_dtype=jnp.float32):
    # matmul_dtype=jnp.bfloat16 is an opt-in MXU speedup on v6e/v7x (small
    # numerical deviation from the f32 PyTorch reference).
    assert batch_size % minibatch_size == 0
    num_minibatches = batch_size // minibatch_size
    num_steps = update_epochs * num_minibatches
    total = num_steps * minibatch_size
    H2 = 2 * hidden
    pack_dim = obs_dim + act_dim + 4

    # Static segment-sum matrices (minibatch membership), built once.
    seg_np = np.zeros((num_steps, total), np.float32)
    for s in range(num_steps):
        seg_np[s, s * minibatch_size:(s + 1) * minibatch_size] = 1.0
    seg = jnp.asarray(seg_np)
    segt = jnp.asarray(seg_np.T)

    kernel = functools.partial(
        _ppo_fused_kernel,
        obs_dim=int(obs_dim), act_dim=int(act_dim),
        minibatch_size=int(minibatch_size),
        clip_coef=float(clip_coef), vf_coef=float(vf_coef),
        norm_adv=bool(norm_adv), clip_vloss=bool(clip_vloss),
        matmul_dtype=matmul_dtype)

    vmem = pltpu.MemorySpace.VMEM
    call = pl.pallas_call(
        kernel,
        in_specs=[pl.BlockSpec(memory_space=vmem)] * 10,
        out_specs=pl.BlockSpec(memory_space=vmem),
        out_shape=jax.ShapeDtypeStruct((num_steps, 6), jnp.float32),
    )

    @jax.jit
    def forward(fused, b_obs, b_act, b_oldlp, b_adv, b_ret, b_val, shuffle_key):
        # Per-epoch permutations, computed and applied on device (one gather).
        keys = jax.random.split(shuffle_key, update_epochs)
        perms = jnp.concatenate(
            [jax.random.permutation(keys[e], batch_size) for e in range(update_epochs)])

        # Fold the Gaussian log-prob constant into the old-logprob column and
        # pack everything into one contiguous (TOTAL, pack_dim) input.
        oldlp_adj = b_oldlp + fused["logp_const"]
        packed = jnp.concatenate([b_obs, b_act, oldlp_adj, b_adv, b_ret, b_val], axis=1)
        packed_p = jnp.take(packed, perms, axis=0)            # (TOTAL, pack_dim)

        stats_mb = call(packed_p, fused["w1"], fused["b1"], fused["w2"], fused["b2"],
                        fused["w3"], fused["b3"], fused["inv_2var"], seg, segt)

        last = stats_mb[num_steps - 1]                         # last minibatch wins
        v_loss, pg_loss, old_kl, kl = last[0], last[1], last[2], last[3]
        clipfrac_mean = jnp.mean(stats_mb[:, 4])
        entropy_loss = fused["entropy_sum"]

        # explained_var (unpermuted buffers), safe divide
        y_pred = b_val[:, 0]
        y_true = b_ret[:, 0]
        var_y = jnp.var(y_true)
        safe_var = jnp.where(var_y == 0, 1.0, var_y)
        explained_var = jnp.where(var_y == 0, jnp.nan,
                                  1.0 - jnp.var(y_true - y_pred) / safe_var)
        return (v_loss, pg_loss, entropy_loss, old_kl, kl, clipfrac_mean, explained_var)

    assert pack_dim == obs_dim + act_dim + 4
    return forward


# ----------------------------------------------------------------------------
# Parameter init (matches PPOAgent.__init__ shapes; orthogonal + const bias)
# ----------------------------------------------------------------------------
def orthogonal_init(key, out_dim, in_dim, gain):
    n, m = max(out_dim, in_dim), min(out_dim, in_dim)
    a = jax.random.normal(key, (n, m), dtype=jnp.float32)
    q, r = jnp.linalg.qr(a)
    q = q * jnp.sign(jnp.diag(r))
    if out_dim < in_dim:
        q = q.T
    return (gain * q[:out_dim, :in_dim]).astype(jnp.float32)   # torch layout (out, in)


def init_agent_params(key, obs_dim, act_dim, hidden=64):
    ks = jax.random.split(key, 6)
    g = float(np.sqrt(2.0))
    # stored transposed -> (in, out) so the kernel does x @ W
    aw1 = orthogonal_init(ks[0], hidden, obs_dim, g).T
    aw2 = orthogonal_init(ks[1], hidden, hidden, g).T
    aw3 = orthogonal_init(ks[2], act_dim, hidden, 0.01).T
    cw1 = orthogonal_init(ks[3], hidden, obs_dim, g).T
    cw2 = orthogonal_init(ks[4], hidden, hidden, g).T
    cw3 = orthogonal_init(ks[5], 1, hidden, 1.0).T
    zeros = lambda *s: jnp.zeros(s, jnp.float32)
    return dict(
        aw1=aw1, ab1=zeros(1, hidden), aw2=aw2, ab2=zeros(1, hidden),
        aw3=aw3, ab3=zeros(1, act_dim), logstd=zeros(1, act_dim),
        cw1=cw1, cb1=zeros(1, hidden), cw2=cw2, cb2=zeros(1, hidden),
        cw3=cw3, cb3=zeros(1, 1),
    )


# ----------------------------------------------------------------------------
if __name__ == "__main__":
    OBS_DIM, ACT_DIM, HIDDEN = 8, 4, 64
    ROLLOUT_STEPS, NUM_ENVS = 8, 4
    args = dict(
        batch_size=ROLLOUT_STEPS * NUM_ENVS,   # 32
        minibatch_size=16,
        update_epochs=2,
        clip_coef=0.2, ent_coef=0.01, vf_coef=0.5,
        norm_adv=True, clip_vloss=True,
    )

    root = jax.random.PRNGKey(0)
    k_param, k_buf, k_shuffle = jax.random.split(root, 3)
    params = init_agent_params(k_param, OBS_DIM, ACT_DIM, HIDDEN)
    fused = fuse_agent_params(params, act_dim=ACT_DIM)   # one-time weight fusion

    kb = jax.random.split(k_buf, 6)
    buffer = dict(
        observations=jax.random.normal(kb[0], (ROLLOUT_STEPS, NUM_ENVS, OBS_DIM), jnp.float32),
        actions=jax.random.normal(kb[1], (ROLLOUT_STEPS, NUM_ENVS, ACT_DIM), jnp.float32),
        logprobs=jax.random.normal(kb[2], (ROLLOUT_STEPS, NUM_ENVS), jnp.float32) * 0.1 - 4.0,
        advantages=jax.random.normal(kb[3], (ROLLOUT_STEPS, NUM_ENVS), jnp.float32),
        returns=jax.random.normal(kb[4], (ROLLOUT_STEPS, NUM_ENVS), jnp.float32),
        values=jax.random.normal(kb[5], (ROLLOUT_STEPS, NUM_ENVS), jnp.float32),
    )

    fwd = make_learner_forward(
        obs_dim=OBS_DIM, act_dim=ACT_DIM, hidden=HIDDEN,
        batch_size=args["batch_size"], minibatch_size=args["minibatch_size"],
        update_epochs=args["update_epochs"], clip_coef=args["clip_coef"],
        ent_coef=args["ent_coef"], vf_coef=args["vf_coef"],
        norm_adv=args["norm_adv"], clip_vloss=args["clip_vloss"])

    b_obs = buffer["observations"].reshape(-1, OBS_DIM)
    b_act = buffer["actions"].reshape(-1, ACT_DIM)
    b_oldlp = buffer["logprobs"].reshape(-1, 1)
    b_adv = buffer["advantages"].reshape(-1, 1)
    b_ret = buffer["returns"].reshape(-1, 1)
    b_val = buffer["values"].reshape(-1, 1)

    result = jax.block_until_ready(
        fwd(fused, b_obs, b_act, b_oldlp, b_adv, b_ret, b_val, k_shuffle))
    v_loss, pg_loss, entropy_loss, old_kl, kl, clipfrac_mean, explained_var = (
        float(v) for v in result)

    assert all(np.isfinite(v) for v in
               (v_loss, pg_loss, entropy_loss, old_kl, kl, clipfrac_mean, explained_var))
    print("KERNEL_OK")
</pallas_src>

<mosaic_0001>
module attributes {stable_mosaic.version = 11 : i64} {
  func.func @_ppo_fused_kernel(%arg0: memref<64x16xf32, #tpu.memory_space<vmem>>, %arg1: memref<8x128xf32, #tpu.memory_space<vmem>>, %arg2: memref<1x128xf32, #tpu.memory_space<vmem>>, %arg3: memref<128x128xf32, #tpu.memory_space<vmem>>, %arg4: memref<1x128xf32, #tpu.memory_space<vmem>>, %arg5: memref<128x5xf32, #tpu.memory_space<vmem>>, %arg6: memref<1x5xf32, #tpu.memory_space<vmem>>, %arg7: memref<1x4xf32, #tpu.memory_space<vmem>>, %arg8: memref<4x64xf32, #tpu.memory_space<vmem>>, %arg9: memref<64x4xf32, #tpu.memory_space<vmem>>, %arg10: memref<4x6xf32, #tpu.memory_space<vmem>>) attributes {dimension_semantics = [], scalar_prefetch = 0 : i64, scratch_operands = 0 : i64, tpu.core_type = #tpu.core_type<tc>} {
    %c0 = arith.constant 0 : index
    %c0_0 = arith.constant 0 : index
    %0 = vector.load %arg0[%c0, %c0_0] : memref<64x16xf32, #tpu.memory_space<vmem>>, vector<64x16xf32>
    %1 = vector.extract_strided_slice %0 {offsets = [0, 0], sizes = [64, 8], strides = [1, 1]} : vector<64x16xf32> to vector<64x8xf32>
    %2 = vector.extract_strided_slice %0 {offsets = [0, 8], sizes = [64, 4], strides = [1, 1]} : vector<64x16xf32> to vector<64x4xf32>
    %3 = vector.extract_strided_slice %0 {offsets = [0, 12], sizes = [64, 1], strides = [1, 1]} : vector<64x16xf32> to vector<64x1xf32>
    %4 = vector.extract_strided_slice %0 {offsets = [0, 13], sizes = [64, 1], strides = [1, 1]} : vector<64x16xf32> to vector<64x1xf32>
    %5 = vector.extract_strided_slice %0 {offsets = [0, 14], sizes = [64, 1], strides = [1, 1]} : vector<64x16xf32> to vector<64x1xf32>
    %6 = vector.extract_strided_slice %0 {offsets = [0, 15], sizes = [64, 1], strides = [1, 1]} : vector<64x16xf32> to vector<64x1xf32>
    %c0_1 = arith.constant 0 : index
    %c0_2 = arith.constant 0 : index
    %7 = vector.load %arg1[%c0_1, %c0_2] : memref<8x128xf32, #tpu.memory_space<vmem>>, vector<8x128xf32>
    %cst = arith.constant dense<0.000000e+00> : vector<64x128xf32>
    %8 = tpu.matmul %1, %7, %cst {dimension_numbers = #tpu.dot_dimension_numbers<[1], [0], [0], [1], [0, 0, 1, 1], [], []>} : vector<64x8xf32>, vector<8x128xf32>, vector<64x128xf32> -> vector<64x128xf32>
    %c0_3 = arith.constant 0 : index
    %c0_4 = arith.constant 0 : index
    %9 = vector.load %arg2[%c0_3, %c0_4] : memref<1x128xf32, #tpu.memory_space<vmem>>, vector<1x128xf32>
    %10 = vector.broadcast %9 : vector<1x128xf32> to vector<64x128xf32>
    %11 = arith.addf %8, %10 : vector<64x128xf32>
    %cst_5 = arith.constant 0.000000e+00 : f32
    %12 = vector.broadcast %cst_5 : f32 to vector<64x128xf32>
    %13 = arith.maximumf %11, %12 : vector<64x128xf32>
    %c0_6 = arith.constant 0 : index
    %c0_7 = arith.constant 0 : index
    %14 = vector.load %arg3[%c0_6, %c0_7] : memref<128x128xf32, #tpu.memory_space<vmem>>, vector<128x128xf32>
    %cst_8 = arith.constant dense<0.000000e+00> : vector<64x128xf32>
    %15 = tpu.matmul %13, %14, %cst_8 {dimension_numbers = #tpu.dot_dimension_numbers<[1], [0], [0], [1], [0, 0, 1, 1], [], []>} : vector<64x128xf32>, vector<128x128xf32>, vector<64x128xf32> -> vector<64x128xf32>
    %c0_9 = arith.constant 0 : index
    %c0_10 = arith.constant 0 : index
    %16 = vector.load %arg4[%c0_9, %c0_10] : memref<1x128xf32, #tpu.memory_space<vmem>>, vector<1x128xf32>
    %17 = vector.broadcast %16 : vector<1x128xf32> to vector<64x128xf32>
    %18 = arith.addf %15, %17 : vector<64x128xf32>
    %cst_11 = arith.constant 0.000000e+00 : f32
    %19 = vector.broadcast %cst_11 : f32 to vector<64x128xf32>
    %20 = arith.maximumf %18, %19 : vector<64x128xf32>
    %c0_12 = arith.constant 0 : index
    %c0_13 = arith.constant 0 : index
    %21 = vector.load %arg5[%c0_12, %c0_13] : memref<128x5xf32, #tpu.memory_space<vmem>>, vector<128x5xf32>
    %cst_14 = arith.constant dense<0.000000e+00> : vector<64x5xf32>
    %22 = tpu.matmul %20, %21, %cst_14 {dimension_numbers = #tpu.dot_dimension_numbers<[1], [0], [0], [1], [0, 0, 1, 1], [], []>} : vector<64x128xf32>, vector<128x5xf32>, vector<64x5xf32> -> vector<64x5xf32>
    %c0_15 = arith.constant 0 : index
    %c0_16 = arith.constant 0 : index
    %23 = vector.load %arg6[%c0_15, %c0_16] : memref<1x5xf32, #tpu.memory_space<vmem>>, vector<1x5xf32>
    %24 = vector.broadcast %23 : vector<1x5xf32> to vector<64x5xf32>
    %25 = arith.addf %22, %24 : vector<64x5xf32>
    %26 = vector.extract_strided_slice %25 {offsets = [0, 0], sizes = [64, 4], strides = [1, 1]} : vector<64x5xf32> to vector<64x4xf32>
    %27 = vector.extract_strided_slice %25 {offsets = [0, 4], sizes = [64, 1], strides = [1, 1]} : vector<64x5xf32> to vector<64x1xf32>
    %28 = arith.subf %2, %26 : vector<64x4xf32>
    %29 = arith.mulf %28, %28 : vector<64x4xf32>
    %c0_17 = arith.constant 0 : index
    %c0_18 = arith.constant 0 : index
    %30 = vector.load %arg7[%c0_17, %c0_18] : memref<1x4xf32, #tpu.memory_space<vmem>>, vector<1x4xf32>
    %31 = vector.broadcast %30 : vector<1x4xf32> to vector<64x4xf32>
    %32 = arith.mulf %29, %31 : vector<64x4xf32>
    %cst_19 = arith.constant dense<0.000000e+00> : vector<64xf32>
    %33 = vector.multi_reduction <add>, %32, %cst_19 [1] : vector<64x4xf32> to vector<64xf32>
    %34 = vector.shape_cast %33 : vector<64xf32> to vector<64x1xf32>
    %cst_20 = arith.constant 0.000000e+00 : f32
    %35 = vector.broadcast %cst_20 : f32 to vector<64x1xf32>
    %36 = arith.subf %35, %34 : vector<64x1xf32>
    %37 = arith.subf %36, %3 : vector<64x1xf32>
    %38 = math.exp %37 : vector<64x1xf32>
    %cst_21 = arith.constant 1.000000e+00 : f32
    %39 = vector.broadcast %cst_21 : f32 to vector<64x1xf32>
    %40 = arith.subf %38, %39 : vector<64x1xf32>
    %41 = math.absf %40 : vector<64x1xf32>
    %cst_22 = arith.constant 2.000000e-01 : f32
    %42 = vector.broadcast %cst_22 : f32 to vector<64x1xf32>
    %43 = arith.cmpf ogt, %41, %42 : vector<64x1xf32>
    %44 = arith.extui %43 : vector<64x1xi1> to vector<64x1xi32>
    %45 = arith.sitofp %44 : vector<64x1xi32> to vector<64x1xf32>
    %46 = arith.subf %27, %5 : vector<64x1xf32>
    %47 = arith.mulf %46, %46 : vector<64x1xf32>
    %48 = arith.subf %27, %6 : vector<64x1xf32>
    %cst_23 = arith.constant -2.000000e-01 : f32
    %cst_24 = arith.constant 2.000000e-01 : f32
    %49 = vector.broadcast %cst_23 : f32 to vector<64x1xf32>
    %50 = arith.maximumf %49, %48 : vector<64x1xf32>
    %51 = vector.broadcast %cst_24 : f32 to vector<64x1xf32>
    %52 = arith.minimumf %51, %50 : vector<64x1xf32>
    %53 = arith.addf %6, %52 : vector<64x1xf32>
    %54 = arith.subf %53, %5 : vector<64x1xf32>
    %55 = arith.subf %53, %5 : vector<64x1xf32>
    %56 = arith.mulf %54, %55 : vector<64x1xf32>
    %57 = arith.maximumf %47, %56 : vector<64x1xf32>
    %cst_25 = arith.constant 0.000000e+00 : f32
    %58 = vector.broadcast %cst_25 : f32 to vector<64x1xf32>
    %59 = arith.subf %58, %37 : vector<64x1xf32>
    %cst_26 = arith.constant 1.000000e+00 : f32
    %60 = vector.broadcast %cst_26 : f32 to vector<64x1xf32>
    %61 = arith.subf %38, %60 : vector<64x1xf32>
    %62 = arith.subf %61, %37 : vector<64x1xf32>
    %63 = arith.mulf %4, %4 : vector<64x1xf32>
    %64 = tpu.concatenate %59, %62, %45, %57, %4, %63 in 1 : vector<64x1xf32>, vector<64x1xf32>, vector<64x1xf32>, vector<64x1xf32>, vector<64x1xf32>, vector<64x1xf32> -> vector<64x6xf32>
    %c0_27 = arith.constant 0 : index
    %c0_28 = arith.constant 0 : index
    %65 = vector.load %arg8[%c0_27, %c0_28] : memref<4x64xf32, #tpu.memory_space<vmem>>, vector<4x64xf32>
    %cst_29 = arith.constant dense<0.000000e+00> : vector<4x6xf32>
    %66 = tpu.matmul %65, %64, %cst_29 {dimension_numbers = #tpu.dot_dimension_numbers<[1], [0], [0], [1], [0, 0, 1, 1], [], []>} : vector<4x64xf32>, vector<64x6xf32>, vector<4x6xf32> -> vector<4x6xf32>
    %67 = vector.extract_strided_slice %66 {offsets = [0, 0], sizes = [4, 1], strides = [1, 1]} : vector<4x6xf32> to vector<4x1xf32>
    %cst_30 = arith.constant 6.250000e-02 : f32
    %68 = vector.broadcast %cst_30 : f32 to vector<4x1xf32>
    %69 = arith.mulf %67, %68 : vector<4x1xf32>
    %70 = vector.extract_strided_slice %66 {offsets = [0, 1], sizes = [4, 1], strides = [1, 1]} : vector<4x6xf32> to vector<4x1xf32>
    %cst_31 = arith.constant 6.250000e-02 : f32
    %71 = vector.broadcast %cst_31 : f32 to vector<4x1xf32>
    %72 = arith.mulf %70, %71 : vector<4x1xf32>
    %73 = vector.extract_strided_slice %66 {offsets = [0, 2], sizes = [4, 1], strides = [1, 1]} : vector<4x6xf32> to vector<4x1xf32>
    %cst_32 = arith.constant 6.250000e-02 : f32
    %74 = vector.broadcast %cst_32 : f32 to vector<4x1xf32>
    %75 = arith.mulf %73, %74 : vector<4x1xf32>
    %76 = vector.extract_strided_slice %66 {offsets = [0, 3], sizes = [4, 1], strides = [1, 1]} : vector<4x6xf32> to vector<4x1xf32>
    %cst_33 = arith.constant 5.000000e-01 : f32
    %77 = vector.broadcast %cst_33 : f32 to vector<4x1xf32>
    %78 = arith.mulf %77, %76 : vector<4x1xf32>
    %cst_34 = arith.constant 6.250000e-02 : f32
    %79 = vector.broadcast %cst_34 : f32 to vector<4x1xf32>
    %80 = arith.mulf %78, %79 : vector<4x1xf32>
    %81 = vector.extract_strided_slice %66 {offsets = [0, 4], sizes = [4, 1], strides = [1, 1]} : vector<4x6xf32> to vector<4x1xf32>
    %cst_35 = arith.constant 6.250000e-02 : f32
    %82 = vector.broadcast %cst_35 : f32 to vector<4x1xf32>
    %83 = arith.mulf %81, %82 : vector<4x1xf32>
    %84 = vector.extract_strided_slice %66 {offsets = [0, 5], sizes = [4, 1], strides = [1, 1]} : vector<4x6xf32> to vector<4x1xf32>
    %cst_36 = arith.constant 1.600000e+01 : f32
    %85 = vector.broadcast %cst_36 : f32 to vector<4x1xf32>
    %86 = arith.mulf %85, %83 : vector<4x1xf32>
    %87 = arith.mulf %86, %83 : vector<4x1xf32>
    %88 = arith.subf %84, %87 : vector<4x1xf32>
    %cst_37 = arith.constant 0.000000e+00 : f32
    %89 = vector.broadcast %cst_37 : f32 to vector<4x1xf32>
    %90 = arith.maximumf %88, %89 : vector<4x1xf32>
    %cst_38 = arith.constant 0.0666666701 : f32
    %91 = vector.broadcast %cst_38 : f32 to vector<4x1xf32>
    %92 = arith.mulf %90, %91 : vector<4x1xf32>
    %93 = math.sqrt %92 : vector<4x1xf32>
    %cst_39 = arith.constant 9.99999993E-9 : f32
    %94 = vector.broadcast %cst_39 : f32 to vector<4x1xf32>
    %95 = arith.addf %93, %94 : vector<4x1xf32>
    %cst_40 = arith.constant 1.000000e+00 : f32
    %96 = vector.broadcast %cst_40 : f32 to vector<4x1xf32>
    %97 = arith.divf %96, %95 : vector<4x1xf32>
    %c0_41 = arith.constant 0 : index
    %c0_42 = arith.constant 0 : index
    %98 = vector.load %arg9[%c0_41, %c0_42] : memref<64x4xf32, #tpu.memory_space<vmem>>, vector<64x4xf32>
    %cst_43 = arith.constant dense<0.000000e+00> : vector<64x1xf32>
    %99 = tpu.matmul %98, %83, %cst_43 {dimension_numbers = #tpu.dot_dimension_numbers<[1], [0], [0], [1], [0, 0, 1, 1], [], []>} : vector<64x4xf32>, vector<4x1xf32>, vector<64x1xf32> -> vector<64x1xf32>
    %c0_44 = arith.constant 0 : index
    %c0_45 = arith.constant 0 : index
    %100 = vector.load %arg9[%c0_44, %c0_45] : memref<64x4xf32, #tpu.memory_space<vmem>>, vector<64x4xf32>
    %cst_46 = arith.constant dense<0.000000e+00> : vector<64x1xf32>
    %101 = tpu.matmul %100, %97, %cst_46 {dimension_numbers = #tpu.dot_dimension_numbers<[1], [0], [0], [1], [0, 0, 1, 1], [], []>} : vector<64x4xf32>, vector<4x1xf32>, vector<64x1xf32> -> vector<64x1xf32>
    %102 = arith.subf %4, %99 : vector<64x1xf32>
    %103 = arith.mulf %102, %101 : vector<64x1xf32>
    %cst_47 = arith.constant 0.000000e+00 : f32
    %104 = vector.broadcast %cst_47 : f32 to vector<64x1xf32>
    %105 = arith.subf %104, %103 : vector<64x1xf32>
    %106 = arith.mulf %105, %38 : vector<64x1xf32>
    %cst_48 = arith.constant 0.000000e+00 : f32
    %107 = vector.broadcast %cst_48 : f32 to vector<64x1xf32>
    %108 = arith.subf %107, %103 : vector<64x1xf32>
    %cst_49 = arith.constant 8.000000e-01 : f32
    %cst_50 = arith.constant 1.200000e+00 : f32
    %109 = vector.broadcast %cst_49 : f32 to vector<64x1xf32>
    %110 = arith.maximumf %109, %38 : vector<64x1xf32>
    %111 = vector.broadcast %cst_50 : f32 to vector<64x1xf32>
    %112 = arith.minimumf %111, %110 : vector<64x1xf32>
    %113 = arith.mulf %108, %112 : vector<64x1xf32>
    %114 = arith.maximumf %106, %113 : vector<64x1xf32>
    %c0_51 = arith.constant 0 : index
    %c0_52 = arith.constant 0 : index
    %115 = vector.load %arg8[%c0_51, %c0_52] : memref<4x64xf32, #tpu.memory_space<vmem>>, vector<4x64xf32>
    %cst_53 = arith.constant dense<0.000000e+00> : vector<4x1xf32>
    %116 = tpu.matmul %115, %114, %cst_53 {dimension_numbers = #tpu.dot_dimension_numbers<[1], [0], [0], [1], [0, 0, 1, 1], [], []>} : vector<4x64xf32>, vector<64x1xf32>, vector<4x1xf32> -> vector<4x1xf32>
    %cst_54 = arith.constant 6.250000e-02 : f32
    %117 = vector.broadcast %cst_54 : f32 to vector<4x1xf32>
    %118 = arith.mulf %116, %117 : vector<4x1xf32>
    %cst_55 = arith.constant 5.000000e-01 : f32
    %119 = vector.broadcast %cst_55 : f32 to vector<4x1xf32>
    %120 = arith.mulf %119, %80 : vector<4x1xf32>
    %121 = arith.addf %118, %120 : vector<4x1xf32>
    %122 = tpu.concatenate %80, %118, %69, %72, %75, %121 in 1 : vector<4x1xf32>, vector<4x1xf32>, vector<4x1xf32>, vector<4x1xf32>, vector<4x1xf32>, vector<4x1xf32> -> vector<4x6xf32>
    %c0_56 = arith.constant 0 : index
    %c0_57 = arith.constant 0 : index
    %123 = vector.load %arg10[%c0_56, %c0_57] : memref<4x6xf32, #tpu.memory_space<vmem>>, vector<4x6xf32>
    tpu.vector_store %arg10[%c0_56, %c0_57], %122 {strides = array<i32>} : memref<4x6xf32, #tpu.memory_space<vmem>>, vector<4x6xf32>,
    return
  }
}

</mosaic_0001>

<bundles_post_ra>
// kernel: forward.1
= control target key start
LH: loop header
LB: loop body
LE: loop exit
PB: predicated region body
PF: predicated region fallthrough
CT: control target
= control target key end

     0   :  { %vm48_vm0 = vcmask 64512   ;;  %s1632_s15 = smov 117   ;;  %s1633_s16 = smov 1   ;;  %vm346_vm1 = vcmask 31744   ;;  %vm859_vm10 = vcmask 7168   ;;  %vm868_vm11 = vcmask 15360   ;;  %s2436_s1 = inlined_call_operand.vmem [shape: f32[8,128], index: 1, kind: input, shape index: {}]   ;;  %s2437_s0 = inlined_call_operand.vmem [shape: f32[64,16], index: 0, kind: input, shape index: {}]   ;;  %s2438_s3 = inlined_call_operand.vmem [shape: f32[128,128], index: 3, kind: input, shape index: {}]   ;;  %s2439_s2 = inlined_call_operand.vmem [shape: f32[1,128], index: 2, kind: input, shape index: {}]   ;;  %s2440_s7 = inlined_call_operand.vmem [shape: f32[1,4], index: 7, kind: input, shape index: {}]   ;;  %s2441_s4 = inlined_call_operand.vmem [shape: f32[1,128], index: 4, kind: input, shape index: {}]   ;;  %s2442_s5 = inlined_call_operand.vmem [shape: f32[128,5], index: 5, kind: input, shape index: {}]   ;;  %s2443_s6 = inlined_call_operand.vmem [shape: f32[1,5], index: 6, kind: input, shape index: {}]   ;;  %s2444_s8 = inlined_call_operand.vmem [shape: f32[4,64], index: 8, kind: input, shape index: {}]   ;;  %s2445_s9 = inlined_call_operand.vmem [shape: f32[64,4], index: 9, kind: input, shape index: {}]   ;;  %s2446_s10 = inlined_call_operand.vmem [shape: f32[4,6], index: 10, kind: output, shape index: {}]  }
   0x1   :  { %v43_v0 = vld [vmem:[%s2436_s1] sm:$0xff]  ;;  %v137_v3 = vld [vmem:[%s2438_s3 + $0x78] sm:$0xff]  ;;  %v136_v4 = vld [vmem:[%s2438_s3 + $0x70] sm:$0xff]  ;;  %s1634_s17 = smov 118   ;;  %s1635_s29 = smov 8   ;;  %vm877_vm12 = vcmask 23552  }
   0x2   :  { %v1710_v1 = vld [vmem:[%s2437_s0] sm:$0xff]  ;;  %88 = vmatpush.msra.mxu0 %v43_v0  ;;  %1422 = vmatpush.msra.mxu1 %v43_v0  ;;  %v135_v5 = vld [vmem:[%s2438_s3 + $0x68] sm:$0xff]  ;;  %v133_v9 = vld [vmem:[%s2438_s3 + $0x58] sm:$0xff]  ;;  %s1638_s22 = smov 120   ;;  %s1640_s23 = smov 116   ;;  %vm894_vm13 = vcmask 39936  }
   0x3   :  { %v1715_v2 = vld [vmem:[%s2437_s0 + $0x20] sm:$0xff]  ;;  %1370 = vmatmul.msk.f32.vlgmr.msra.gmra.mxu0 %vm48_vm0, %v1710_v1  ;;  %v1733_v6 = vld [vmem:[%s2437_s0 + $0x8] sm:$0xff]  ;;  %v132_v10 = vld [vmem:[%s2438_s3 + $0x50] sm:$0xff]  ;;  %vm904_vm14 = vcmask 523264   ;;  %s1642_s28 = smov 124   ;;  %vm1003_vm15 = vcmask 1043456  }
   0x4   :  { %1374 = vmatmul.msk.f32.vlgmr.msra.gmra.mxu1 %vm48_vm0, %v1715_v2  ;;  %v1738_v7 = vld [vmem:[%s2437_s0 + $0x28] sm:$0xff]  ;;  %v134_v8 = vld [vmem:[%s2438_s3 + $0x60] sm:$0xff]  ;;  %v1759_v12 = vld [vmem:[%s2437_s0 + $0x10] sm:$0xff]  ;;  %s1647_s11 = smov 2  }
   0x5   :  { %142 = vmatpush.msrb.mxu1 %v137_v3  ;;  %v131_v11 = vld [vmem:[%s2438_s3 + $0x48] sm:$0xff]  ;;  %v1764_v13 = vld [vmem:[%s2437_s0 + $0x30] sm:$0xff]  ;;  %v130_v14 = vld [vmem:[%s2438_s3 + $0x40] sm:$0xff]  ;;  %493 = vrot.lane.b32.xlu2 %v1738_v7, %s1632_s15 }
   0x6   :  { %v129_v15 = vld [vmem:[%s2438_s3 + $0x38] sm:$0xff]  ;;  %v128_v16 = vld [vmem:[%s2438_s3 + $0x30] sm:$0xff]  ;;  %v127_v17 = vld [vmem:[%s2438_s3 + $0x28] sm:$0xff] }
   0x7   :  { %143 = vmatpush.msrb.mxu1 %v136_v4  ;;  %v1785_v18 = vld [vmem:[%s2437_s0 + $0x18] sm:$0xff]  ;;  %v126_v20 = vld [vmem:[%s2438_s3 + $0x20] sm:$0xff]  ;;  %v124_v22 = vld [vmem:[%s2438_s3 + $0x10] sm:$0xff] }
   0x8   :  { %v1790_v19 = vld [vmem:[%s2437_s0 + $0x38] sm:$0xff]  ;;  %v123_v23 = vld [vmem:[%s2438_s3 + $0x8] sm:$0xff]  ;;  %v122_v24 = vld [vmem:[%s2438_s3] sm:$0xff] }
   0x9   :  { %144 = vmatpush.msrb.mxu1 %v135_v5  ;;  %v125_v21 = vld [vmem:[%s2438_s3 + $0x18] sm:$0xff]  ;;  %497 = vrot.lane.b32.xlu0 %v1790_v19, %s1632_s15  ;;  %v1600_v25 = vld [vmem:[%s2439_s2] ss:$0 sm:$0xff]  ;;  %v205_v42 = vld [vmem:[%s2442_s5 + $0x70] sm:$0xff]  ;;  %s1645_s3 = smov 115  }
   0xa   :  { %v1601_v40 = vld [vmem:[%s2440_s7] ss:$0 sm:$0xff]  ;;  %v206_v41 = vld [vmem:[%s2442_s5 + $0x78] sm:$0xff]  ;;  %v204_v44 = vld [vmem:[%s2442_s5 + $0x68] sm:$0xff] }
   0xb   :  { %1371 = vmatmul.msk.f32.gmra.mxu0 %vm48_vm0, %v1733_v6  ;;  %145 = vmatpush.msrb.mxu1 %v134_v8  ;;  %v203_v46 = vld [vmem:[%s2442_s5 + $0x60] sm:$0xff]  ;;  %v202_v47 = vld [vmem:[%s2442_s5 + $0x58] sm:$0xff]  ;;  %v201_v49 = vld [vmem:[%s2442_s5 + $0x50] sm:$0xff] }
   0xc   :  { %1375 = vmatmul.msk.f32.gmra.mxu1 %vm48_vm0, %v1738_v7  ;;  %211 = vmatpush.msra.mxu2 %v206_v41  ;;  %v200_v50 = vld [vmem:[%s2442_s5 + $0x48] sm:$0xff]  ;;  %v199_v53 = vld [vmem:[%s2442_s5 + $0x40] sm:$0xff]  ;;  %v198_v54 = vld [vmem:[%s2442_s5 + $0x38] sm:$0xff] }
   0xd   :  { %146 = vmatpush.msrb.mxu1 %v133_v9  ;;  %487 = vrot.lane.b32.xlu2 %v1759_v12, %s1632_s15  ;;  %v197_v56 = vld [vmem:[%s2442_s5 + $0x30] sm:$0xff]  ;;  %v196_v57 = vld [vmem:[%s2442_s5 + $0x28] sm:$0xff]  ;;  %v195_v59 = vld [vmem:[%s2442_s5 + $0x20] sm:$0xff] }
   0xe   :  { %303 = vrot.lane.b32.xlu1 %v1601_v40, %s1635_s29  ;;  %212 = vmatpush.msra.mxu2 %v205_v42  ;;  %v194_v61 = vld [vmem:[%s2442_s5 + $0x18] sm:$0xff]  ;;  %v193_v63 = vld [vmem:[%s2442_s5 + $0x10] sm:$0xff]  ;;  %v192_v3 = vld [vmem:[%s2442_s5 + $0x8] sm:$0xff] }
   0xf   :  { %147 = vmatpush.msrb.mxu1 %v132_v10  ;;  %v191_v4 = vld [vmem:[%s2442_s5] sm:$0xff] }
  0x10   :  { %213 = vmatpush.msra.mxu2 %v204_v44  ;;  %v1602_v5 = vld [vmem:[%s2441_s4] ss:$0 sm:$0xff]  ;;  %s1636_s4 = smov 119  }
  0x11   :  { %148 = vmatpush.msrb.mxu1 %v131_v11  ;;  %491 = vrot.lane.b32.xlu0 %v1715_v2, %s1632_s15 }
  0x12   :  { %214 = vmatpush.msra.mxu2 %v203_v46 }
  0x13   :  { %1372 = vmatmul.msk.f32.gmra.mxu0 %vm48_vm0, %v1759_v12  ;;  %149 = vmatpush.msrb.mxu1 %v130_v14 }
  0x14   :  { %1376 = vmatmul.msk.f32.gmra.mxu1 %vm48_vm0, %v1764_v13  ;;  %215 = vmatpush.msra.mxu2 %v202_v47 }
  0x15   :  { %150 = vmatpush.msrb.mxu1 %v129_v15  ;;  %583 = vrot.lane.b32.xlu2 %v1764_v13, %s1633_s16 }
  0x16   :  { %495 = vrot.lane.b32.xlu1 %v1764_v13, %s1632_s15  ;;  %216 = vmatpush.msra.mxu2 %v201_v49  ;;  %v1603_v49 = vld [vmem:[%s2443_s6] ss:$0 sm:$0xff]  ;;  %s1637_s6 = smov 11  }
  0x17   :  { %151 = vmatpush.msrb.mxu1 %v128_v16 }
  0x18   :  { %217 = vmatpush.msra.mxu2 %v200_v50 }
  0x19   :  { %152 = vmatpush.msrb.mxu1 %v127_v17  ;;  %485 = vrot.lane.b32.xlu0 %v1733_v6, %s1632_s15 }
  0x1a   :  { %218 = vmatpush.msra.mxu2 %v199_v53 }
  0x1b   :  { %1373 = vmatmul.msk.f32.gmra.mxu0 %vm48_vm0, %v1785_v18  ;;  %153 = vmatpush.msrb.mxu1 %v126_v20 }
  0x1c   :  { %1377 = vmatmul.msk.f32.gmra.mxu1 %vm48_vm0, %v1790_v19  ;;  %219 = vmatpush.msra.mxu2 %v198_v54 }
  0x1d   :  { %154 = vmatpush.msrb.mxu1 %v125_v21  ;;  %577 = vrot.lane.b32.xlu2 %v1785_v18, %s1633_s16 }
  0x1e   :  { %489 = vrot.lane.b32.xlu1 %v1785_v18, %s1632_s15  ;;  %220 = vmatpush.msra.mxu2 %v197_v56 }
  0x1f   :  { %155 = vmatpush.msrb.mxu1 %v124_v22 }
  0x20   :  { %221 = vmatpush.msra.mxu2 %v196_v57 }
  0x21   :  { %585 = vrot.lane.b32.xlu0 %v1790_v19, %s1633_s16  ;;  %156 = vmatpush.msrb.mxu1 %v123_v23 }
  0x22   :  { %222 = vmatpush.msra.mxu2 %v195_v59 }
  0x23   :  { %157 = vmatpush.msrb.mxu1 %v122_v24 }
  0x24   :  { %223 = vmatpush.msra.mxu2 %v194_v61 }
  0x25   :  { %453 = vrot.lane.b32.xlu2 %v1738_v7, %s1634_s17 }
  0x26   :  { %483 = vrot.lane.b32.xlu1 %v1710_v1, %s1632_s15  ;;  %224 = vmatpush.msra.mxu2 %v193_v63 }
  0x28   :  { %225 = vmatpush.msra.mxu2 %v192_v3 }
  0x29   :  { %579 = vrot.lane.b32.xlu0 %v1715_v2, %s1633_s16 }
  0x2a   :  { %226 = vmatpush.msra.mxu2 %v191_v4 }
  0x2e   :  { %581 = vrot.lane.b32.xlu1 %v1738_v7, %s1633_s16 }
  0x31   :  { %573 = vrot.lane.b32.xlu0 %v1733_v6, %s1633_s16 }
  0x36   :  { %575 = vrot.lane.b32.xlu1 %v1759_v12, %s1633_s16 }
  0x39   :  { %457 = vrot.lane.b32.xlu0 %v1790_v19, %s1634_s17 }
  0x3e   :  { %571 = vrot.lane.b32.xlu1 %v1710_v1, %s1633_s16 }
  0x41   :  { %449 = vrot.lane.b32.xlu0 %v1785_v18, %s1634_s17 }
  0x46   :  { %455 = vrot.lane.b32.xlu1 %v1764_v13, %s1634_s17 }
  0x49   :  { %445 = vrot.lane.b32.xlu0 %v1733_v6, %s1634_s17 }
  0x4e   :  { %451 = vrot.lane.b32.xlu1 %v1715_v2, %s1634_s17 }
  0x56   :  { %447 = vrot.lane.b32.xlu1 %v1759_v12, %s1634_s17 }
  0x5e   :  { %443 = vrot.lane.b32.xlu1 %v1710_v1, %s1634_s17 }
  0x5f   :  { %v494_v53 = vpop.permute.xlu2 %493 }
  0x67   :  { %v488_v61 = vpop.permute.xlu2 %487 }
  0x80   :  { %v90_v26 = vpop.f32.mrf.mxu0 }
  0x81   :  { %v91_v27 = vadd.f32 %v1600_v25, %v90_v26  ;;  %v102_v35 = vpop.f32.mrf.mxu1 }
  0x82   :  { %v103_v39 = vadd.f32 %v1600_v25, %v102_v35 }
  0x83   :  { %v114_v28 = vmax.f32 %v91_v27, 0.0 }
  0x84   :  { %v118_v45 = vmax.f32 %v103_v39, 0.0  ;;  %v1921_v39 = vpop.permute.xlu0 %497 }
  0x85   :  { %158 = vmatmul.f32.vlgmr.msrb.gmra.mxu1 %v114_v28 }
  0x88   :  { %v93_v29 = vpop.f32.mrf.mxu0 }
  0x89   :  { %v94_v30 = vadd.f32 %v1600_v25, %v93_v29  ;;  %v105_v43 = vpop.f32.mrf.mxu1 }
  0x8a   :  { %v106_v48 = vadd.f32 %v1600_v25, %v105_v43  ;;  %v1440_v43 = vpack.i.bf16 %v1764_v13, %v1790_v19 }
  0x8b   :  { %v115_v31 = vmax.f32 %v94_v30, 0.0 }
  0x8c   :  { %v119_v52 = vmax.f32 %v106_v48, 0.0  ;;  %v492_v41 = vpop.permute.xlu0 %491  ;;  %1441 = vrot.lane.b32.xlu1 %v1440_v43, %s1636_s4 }
  0x8d   :  { %161 = vmatmul.f32.gmra.mxu1 %v115_v31 }
  0x90   :  { %v96_v32 = vpop.f32.mrf.mxu0 }
  0x91   :  { %v97_v33 = vadd.f32 %v1600_v25, %v96_v32  ;;  %v108_v51 = vpop.f32.mrf.mxu1 }
  0x92   :  { %v109_v55 = vadd.f32 %v1600_v25, %v108_v51 }
  0x93   :  { %v116_v34 = vmax.f32 %v97_v33, 0.0 }
  0x94   :  { %v120_v58 = vmax.f32 %v109_v55, 0.0  ;;  %v486_v44 = vpop.permute.xlu0 %485 }
  0x95   :  { %164 = vmatmul.f32.gmra.mxu1 %v116_v34 }
  0x98   :  { %v99_v36 = vpop.f32.mrf.mxu0 }
  0x99   :  { %v100_v37 = vadd.f32 %v1600_v25, %v99_v36  ;;  %v111_v60 = vpop.f32.mrf.mxu1  ;;  %v1917_v36 = vpop.permute.xlu1 %303 }
  0x9a   :  { %v112_v62 = vadd.f32 %v1600_v25, %v111_v60 }
  0x9b   :  { %v117_v38 = vmax.f32 %v100_v37, 0.0 }
  0x9c   :  { %v121_v0 = vmax.f32 %v112_v62, 0.0  ;;  %v1930_v46 = vpop.permute.xlu0 %585 }
  0x9d   :  { %167 = vmatmul.f32.gmra.mxu1 %v117_v38 }
  0xa1   :  { %v1919_v37 = vpop.permute.xlu1 %495 }
  0xa4   :  { %v1934_v48 = vpop.permute.xlu0 %579 }
  0xa5   :  { %170 = vmatmul.f32.gmra.mxu1 %v118_v45 }
  0xa9   :  { %v490_v38 = vpop.permute.xlu1 %489 }
  0xac   :  { %v1946_v55 = vpop.permute.xlu0 %573 }
  0xad   :  { %173 = vmatmul.f32.gmra.mxu1 %v119_v52 }
  0xb1   :  { %v484_v40 = vpop.permute.xlu1 %483 }
  0xb4   :  { %v1957_v63 = vpop.permute.xlu0 %457 }
  0xb5   :  { %176 = vmatmul.f32.gmra.mxu1 %v120_v58 }
  0xb9   :  { %v1923_v42 = vpop.permute.xlu1 %581 }
  0xbd   :  { %179 = vmatmul.f32.gmra.mxu1 %v121_v0 }
  0xc1   :  { %v1928_v45 = vpop.permute.xlu1 %575 }
  0xc9   :  { %v1932_v47 = vpop.permute.xlu1 %571 }
  0xd1   :  { %v1939_v50 = vpop.permute.xlu1 %455 }
  0xd9   :  { %v1948_v56 = vpop.permute.xlu1 %451 }
  0xe1   :  { %v448_v4 = vpop.permute.xlu1 %447 }
 0x102   :  { %v159_v8 = vpop.f32.mrf.mxu1 }
 0x103   :  { %v160_v9 = vadd.f32 %v1602_v5, %v159_v8 }
 0x105   :  { %v183_v10 = vmax.f32 %v160_v9, 0.0  ;;  %v1961_v9 = vpop.permute.xlu2 %583 }
 0x107   :  { %227 = vmatmul.f32.vlgmr.msra.gmra.mxu2 %v183_v10 }
 0x10a   :  { %v162_v11 = vpop.f32.mrf.mxu1 }
 0x10b   :  { %v163_v14 = vadd.f32 %v1602_v5, %v162_v11 }
 0x10d   :  { %v184_v15 = vmax.f32 %v163_v14, 0.0 }
 0x10f   :  { %230 = vmatmul.f32.gmra.mxu2 %v184_v15  ;;  %v450_v15 = vpop.permute.xlu0 %449 }
 0x112   :  { %v165_v16 = vpop.f32.mrf.mxu1 }
 0x113   :  { %v166_v17 = vadd.f32 %v1602_v5, %v165_v16 }
 0x115   :  { %v185_v20 = vmax.f32 %v166_v17, 0.0 }
 0x117   :  { %233 = vmatmul.f32.gmra.mxu2 %v185_v20  ;;  %v578_v20 = vpop.permute.xlu2 %577 }
 0x11a   :  { %v168_v21 = vpop.f32.mrf.mxu1 }
 0x11b   :  { %v169_v22 = vadd.f32 %v1602_v5, %v168_v21 }
 0x11d   :  { %v186_v23 = vmax.f32 %v169_v22, 0.0 }
 0x11f   :  { %236 = vmatmul.f32.gmra.mxu2 %v186_v23 }
 0x122   :  { %v171_v24 = vpop.f32.mrf.mxu1 }
 0x123   :  { %v172_v25 = vadd.f32 %v1602_v5, %v171_v24 }
 0x125   :  { %v187_v26 = vmax.f32 %v172_v25, 0.0 }
 0x127   :  { %239 = vmatmul.f32.gmra.mxu2 %v187_v26 }
 0x12a   :  { %v174_v27 = vpop.f32.mrf.mxu1 }
 0x12b   :  { %v175_v28 = vadd.f32 %v1602_v5, %v174_v27  ;;  %v454_v27 = vpop.permute.xlu2 %453 }
 0x12d   :  { %v188_v29 = vmax.f32 %v175_v28, 0.0 }
 0x12f   :  { %242 = vmatmul.f32.gmra.mxu2 %v188_v29  ;;  %v673_v29 = vmul.f32 %v1764_v13, %v1764_v13 }
 0x132   :  { %v177_v30 = vpop.f32.mrf.mxu1 }
 0x133   :  { %v178_v31 = vadd.f32 %v1602_v5, %v177_v30  ;;  %v674_v30 = vmul.f32 %v1790_v19, %v1790_v19 }
 0x135   :  { %v189_v32 = vmax.f32 %v178_v31, 0.0 }
 0x137   :  { %245 = vmatmul.f32.gmra.mxu2 %v189_v32  ;;  %v1445_v32 = vpack.i.bf16 %v673_v29, %v674_v30 }
 0x13a   :  { %v180_v33 = vpop.f32.mrf.mxu1 }
 0x13b   :  { %v181_v34 = vadd.f32 %v1602_v5, %v180_v33 }
 0x13d   :  { %v190_v35 = vmax.f32 %v181_v34, 0.0 }
 0x13f   :  { %248 = vmatmul.f32.gmra.mxu2 %v190_v35 }
 0x18a   :  { %v228_v51 = vpop.f32.mrf.mxu2 }
 0x18b   :  { %v1941_v52 = vadd.f32 %v1603_v49, %v228_v51 }
 0x18d   :  { %260 = vrot.lane.b32.xlu2 %v1941_v52, %s1635_s29  ;;  %v507_v54 = vsub.f32 %v1941_v52, %v484_v40 }
 0x18f   :  { %v1394_v59 = vclamps-f32 %v507_v54, 0.2 }
 0x192   :  { %v231_v57 = vpop.f32.mrf.mxu2 }
 0x193   :  { %v1950_v58 = vadd.f32 %v1603_v49, %v231_v57 }
 0x195   :  { %262 = vrot.lane.b32.xlu1 %v1950_v58, %s1635_s29  ;;  %539 = vrot.lane.b32.xlu2 %v1394_v59, %s1637_s6  ;;  %v508_v60 = vsub.f32 %v1950_v58, %v486_v44 }
 0x197   :  { %v1395_v62 = vclamps-f32 %v508_v60, 0.2 }
 0x199   :  { %541 = vrot.lane.b32.xlu0 %v1395_v62, %s1637_s6  ;;  %v2005_v62 = vpop.permute.xlu0 %445 }
 0x19a   :  { %v234_v0 = vpop.f32.mrf.mxu2 }
 0x19b   :  { %v235_v3 = vadd.f32 %v1603_v49, %v234_v0 }
 0x19d   :  { %v1959_v5 = vsub.f32 %v235_v3, %v448_v4  ;;  %v509_v8 = vsub.f32 %v235_v3, %v488_v61 }
 0x19f   :  { %v1396_v10 = vclamps-f32 %v509_v8, 0.2 }
 0x1a1   :  { %543 = vrot.lane.b32.xlu1 %v1396_v10, %s1637_s6  ;;  %264 = vrot.lane.b32.xlu0 %v235_v3, %s1635_s29 }
 0x1a2   :  { %v237_v11 = vpop.f32.mrf.mxu2 }
 0x1a3   :  { %v238_v14 = vadd.f32 %v1603_v49, %v237_v11 }
 0x1a5   :  { %v1965_v16 = vsub.f32 %v238_v14, %v450_v15  ;;  %266 = vrot.lane.b32.xlu2 %v238_v14, %s1635_s29  ;;  %v510_v17 = vsub.f32 %v238_v14, %v490_v38 }
 0x1a7   :  { %v1397_v23 = vclamps-f32 %v510_v17, 0.2 }
 0x1aa   :  { %v240_v21 = vpop.f32.mrf.mxu2 }
 0x1ab   :  { %v1968_v22 = vadd.f32 %v1603_v49, %v240_v21 }
 0x1ad   :  { %545 = vrot.lane.b32.xlu2 %v1397_v23, %s1637_s6  ;;  %v511_v24 = vsub.f32 %v1968_v22, %v492_v41 }
 0x1af   :  { %v1398_v25 = vclamps-f32 %v511_v24, 0.2 }
 0x1b1   :  { %547 = vrot.lane.b32.xlu0 %v1398_v25, %s1637_s6 }
 0x1b2   :  { %v243_v26 = vpop.f32.mrf.mxu2 }
 0x1b3   :  { %v244_v28 = vadd.f32 %v1603_v49, %v243_v26 }
 0x1b5   :  { %270 = vrot.lane.b32.xlu1 %v244_v28, %s1635_s29  ;;  %268 = vrot.lane.b32.xlu2 %v1968_v22, %s1635_s29  ;;  %v1980_v31 = vsub.f32 %v244_v28, %v454_v27  ;;  %v512_v40 = vsub.f32 %v244_v28, %v494_v53 }
 0x1b7   :  { %v1399_v44 = vclamps-f32 %v512_v40, 0.2 }
 0x1ba   :  { %v246_v33 = vpop.f32.mrf.mxu2 }
 0x1bb   :  { %v1982_v34 = vadd.f32 %v1603_v49, %v246_v33 }
 0x1bd   :  { %1446 = vrot.lane.b32.xlu1 %v1445_v32, %s1638_s22  ;;  %272 = vrot.lane.b32.xlu0 %v1982_v34, %s1635_s29  ;;  %v513_v35 = vsub.f32 %v1982_v34, %v1919_v37 }
 0x1bf   :  { %v1400_v38 = vclamps-f32 %v513_v35, 0.2 }
 0x1c1   :  { %551 = vrot.lane.b32.xlu2 %v1400_v38, %s1637_s6 }
 0x1c2   :  { %v249_v41 = vpop.f32.mrf.mxu2 }
 0x1c3   :  { %v1990_v43 = vadd.f32 %v1603_v49, %v249_v41  ;;  %v2001_v49 = vpop.permute.xlu1 %443 }
 0x1c5   :  { %549 = vrot.lane.b32.xlu1 %v1399_v44, %s1637_s6  ;;  %274 = vrot.lane.b32.xlu0 %v1990_v43, %s1635_s29  ;;  %v514_v51 = vsub.f32 %v1990_v43, %v1921_v39  ;;  %s1639_s29 = smov 127  }
 0x1c7   :  { %v1401_v54 = vclamps-f32 %v514_v51, 0.2 }
 0x1cb   :  { %v2003_v61 = vpop.permute.xlu1 %1441 }
 0x1cd   :  { %553 = vrot.lane.b32.xlu1 %v1401_v54, %s1637_s6 }
 0x1e7   :  { %v261_v37 = vpop.permute.xlu2 %260 }
 0x1e8   :  { %v284_v53 = vsub.f32 %v1710_v1, %v261_v37 }
 0x1ea   :  { %v292_v57 = vmul.f32 %v284_v53, %v284_v53 }
 0x1ec   :  { %v306_v59 = vmul.f32 %v1917_v36, %v292_v57 }
 0x1ee   :  { %322 = vrot.lane.b32.xlu0 %v306_v59, %s1638_s22 }
 0x1ef   :  { %v540_v60 = vpop.permute.xlu2 %539 }
 0x1f0   :  { %v563_v3 = vadd.f32 %v540_v60, %v1710_v1 }
 0x1f2   :  { %v595_v11 = vsub.f32 %v563_v3, %v1932_v47 }
 0x1f4   :  { %v603_v23 = vmul.f32 %v595_v11, %v595_v11 }
 0x1ff   :  { %v267_v0 = vpop.permute.xlu2 %266 }
 0x200   :  { %v287_v26 = vsub.f32 %v1785_v18, %v267_v0 }
 0x202   :  { %v295_v33 = vmul.f32 %v287_v26, %v287_v26 }
 0x204   :  { %v309_v51 = vmul.f32 %v1917_v36, %v295_v33 }
 0x207   :  { %v263_v39 = vpop.permute.xlu1 %262  ;;  %v546_v17 = vpop.permute.xlu2 %545 }
 0x208   :  { %v285_v4 = vsub.f32 %v1733_v6, %v263_v39  ;;  %v566_v24 = vadd.f32 %v546_v17, %v1785_v18 }
 0x20a   :  { %v293_v8 = vmul.f32 %v285_v4, %v285_v4  ;;  %v598_v30 = vsub.f32 %v566_v24, %v578_v20 }
 0x20b   :  { %v542_v10 = vpop.permute.xlu0 %541 }
 0x20c   :  { %v307_v14 = vmul.f32 %v1917_v36, %v293_v8  ;;  %v564_v15 = vadd.f32 %v542_v10, %v1733_v6  ;;  %v606_v40 = vmul.f32 %v598_v30, %v598_v30  ;;  %v1460_v10 = vpack.i.bf16 %v1715_v2, %v1738_v7 }
 0x20e   :  { %v596_v21 = vsub.f32 %v564_v15, %v1946_v55  ;;  %324 = vrot.lane.b32.xlu2 %v307_v14, %s1638_s22 }
 0x20f   :  { %v269_v38 = vpop.permute.xlu2 %268 }
 0x210   :  { %v604_v25 = vmul.f32 %v596_v21, %v596_v21  ;;  %v288_v54 = vsub.f32 %v1715_v2, %v269_v38 }
 0x212   :  { %v1450_v27 = vpack.i.bf16 %v603_v23, %v604_v25  ;;  %v296_v37 = vmul.f32 %v288_v54, %v288_v54 }
 0x213   :  { %v544_v28 = vpop.permute.xlu1 %543  ;;  %v265_v29 = vpop.permute.xlu0 %264 }
 0x214   :  { %v565_v47 = vadd.f32 %v544_v28, %v1759_v12  ;;  %v286_v32 = vsub.f32 %v1759_v12, %v265_v29  ;;  %1451 = vrot.lane.b32.xlu0 %v1450_v27, %s1632_s15 }
 0x216   :  { %v597_v55 = vsub.f32 %v565_v47, %v1928_v45  ;;  %v294_v35 = vmul.f32 %v286_v32, %v286_v32  ;;  %v310_v45 = vmul.f32 %v1917_v36, %v296_v37 }
 0x218   :  { %v605_v41 = vmul.f32 %v597_v55, %v597_v55  ;;  %v308_v44 = vmul.f32 %v1917_v36, %v294_v35 }
 0x21a   :  { %326 = vrot.lane.b32.xlu1 %v308_v44, %s1638_s22  ;;  %v1455_v20 = vpack.i.bf16 %v605_v41, %v606_v40 }
 0x21b   :  { %v552_v23 = vpop.permute.xlu2 %551 }
 0x21c   :  { %328 = vrot.lane.b32.xlu0 %v309_v51, %s1638_s22  ;;  %1456 = vrot.lane.b32.xlu2 %v1455_v20, %s1632_s15  ;;  %v569_v26 = vadd.f32 %v552_v23, %v1764_v13 }
 0x21e   :  { %v601_v32 = vsub.f32 %v569_v26, %v1961_v9 }
 0x220   :  { %v609_v35 = vmul.f32 %v601_v32, %v601_v32 }
 0x223   :  { %v548_v53 = vpop.permute.xlu0 %547 }
 0x224   :  { %330 = vrot.lane.b32.xlu2 %v310_v45, %s1638_s22  ;;  %v567_v11 = vadd.f32 %v548_v53, %v1715_v2 }
 0x226   :  { %v599_v17 = vsub.f32 %v567_v11, %v1934_v48 }
 0x227   :  { %v271_v57 = vpop.permute.xlu1 %270 }
 0x228   :  { %v289_v59 = vsub.f32 %v1738_v7, %v271_v57  ;;  %v607_v27 = vmul.f32 %v599_v17, %v599_v17 }
 0x22a   :  { %v297_v60 = vmul.f32 %v289_v59, %v289_v59  ;;  %v467_v59 = vsub.f32 %v1941_v52, %v2001_v49  ;;  %v471_v49 = vsub.f32 %v1968_v22, %v1948_v56  ;;  %v473_v22 = vsub.f32 %v1982_v34, %v1939_v50 }
 0x22c   :  { %v311_v0 = vmul.f32 %v1917_v36, %v297_v60  ;;  %v468_v60 = vsub.f32 %v1950_v58, %v2005_v62  ;;  %v479_v23 = vmul.f32 %v471_v49, %v471_v49 }
 0x22e   :  { %332 = vrot.lane.b32.xlu1 %v311_v0, %s1638_s22 }
 0x22f   :  { %v2031_v39 = vpop.permute.xlu1 %1446  ;;  %v273_v3 = vpop.permute.xlu0 %272 }
 0x230   :  { %v290_v4 = vsub.f32 %v1764_v13, %v273_v3  ;;  %v475_v3 = vmul.f32 %v467_v59, %v467_v59  ;;  %v672_v59 = vmul.f32 %v1738_v7, %v1738_v7 }
 0x232   :  { %v298_v8 = vmul.f32 %v290_v4, %v290_v4  ;;  %v476_v4 = vmul.f32 %v468_v60, %v468_v60 }
 0x234   :  { %v312_v14 = vmul.f32 %v1917_v36, %v298_v8 }
 0x236   :  { %334 = vrot.lane.b32.xlu0 %v312_v14, %s1638_s22  ;;  %1461 = vrot.lane.b32.xlu1 %v1460_v10, %s1636_s4 }
 0x237   :  { %v550_v15 = vpop.permute.xlu1 %549  ;;  %v275_v25 = vpop.permute.xlu0 %274 }
 0x238   :  { %v568_v21 = vadd.f32 %v550_v15, %v1738_v7  ;;  %v291_v29 = vsub.f32 %v1790_v19, %v275_v25 }
 0x23a   :  { %v600_v24 = vsub.f32 %v568_v21, %v1923_v42  ;;  %v299_v48 = vmul.f32 %v291_v29, %v291_v29 }
 0x23c   :  { %v608_v28 = vmul.f32 %v600_v24, %v600_v24  ;;  %v313_v38 = vmul.f32 %v1917_v36, %v299_v48  ;;  %v478_v36 = vmul.f32 %v1965_v16, %v1965_v16  ;;  %v480_v24 = vmul.f32 %v1980_v31, %v1980_v31 }
 0x23d   :  { %v474_v31 = vsub.f32 %v1990_v43, %v1957_v63  ;;  %v481_v48 = vmul.f32 %v473_v22, %v473_v22 }
 0x23e   :  { %v1465_v30 = vpack.i.bf16 %v607_v27, %v608_v28 }
 0x23f   :  { %v554_v47 = vpop.permute.xlu1 %553 }
 0x240   :  { %v570_v33 = vadd.f32 %v554_v47, %v1790_v19  ;;  %1466 = vrot.lane.b32.xlu2 %v1465_v30, %s1632_s15 }
 0x242   :  { %v602_v55 = vsub.f32 %v570_v33, %v1930_v46  ;;  %v477_v46 = vmul.f32 %v1959_v5, %v1959_v5 }
 0x244   :  { %v610_v42 = vmul.f32 %v602_v55, %v602_v55  ;;  %v482_v55 = vmul.f32 %v474_v31, %v474_v31 }
 0x246   :  { %v1470_v40 = vpack.i.bf16 %v609_v35, %v610_v42 }
 0x248   :  { %336 = vrot.lane.b32.xlu2 %v313_v38, %s1638_s22  ;;  %1471 = vrot.lane.b32.xlu0 %v1470_v40, %s1632_s15 }
 0x260   :  { %v323_v44 = vpop.permute.xlu0 %322 }
 0x261   :  { %v347_v51 = vsel %vm346_vm1, %v323_v44, 0.0 }
 0x268   :  { %v325_v41 = vpop.permute.xlu2 %324 }
 0x269   :  { %v350_v9 = vsel %vm346_vm1, %v325_v41, 0.0 }
 0x26a   :  { %351 = vadd.xlane.f32.xlu1 %v350_v9 }
 0x271   :  { %348 = vadd.xlane.f32.xlu2 %v347_v51 }
 0x276   :  { %v1457_v54 = vpop.permute.xlu2 %1456 }
 0x277   :  { %v1459_v20 = vunpack.i.h.bf16 %v1457_v54  ;;  %v1458_v37 = vunpack.i.l.bf16 %v1457_v54 }
 0x279   :  { %v645_v45 = vmax.f32 %v477_v46, %v1459_v20  ;;  %v646_v53 = vmax.f32 %v478_v36, %v1458_v37 }
 0x27b   :  { %v1480_v57 = vpack.i.bf16 %v645_v45, %v646_v53 }
 0x27e   :  { %v331_v58 = vpop.permute.xlu2 %330 }
 0x27f   :  { %v359_v62 = vsel %vm346_vm1, %v331_v58, 0.0 }
 0x286   :  { %v1452_v0 = vpop.permute.xlu0 %1451 }
 0x287   :  { %v1454_v8 = vunpack.i.h.bf16 %v1452_v0  ;;  %v1453_v10 = vunpack.i.l.bf16 %v1452_v0 }
 0x289   :  { %v2062_v5 = vmax.f32 %v475_v3, %v1454_v8  ;;  %v2064_v11 = vmax.f32 %v476_v4, %v1453_v10 }
 0x28b   :  { %v1565_v16 = vpack.i.bf16 %v2062_v5, %v2064_v11  ;;  %v2186_v5 = vld [vmem:[%s2437_s0 + $0x8] sm:$0xff] }
 0x28c   :  { %v327_v14 = vpop.permute.xlu1 %326  ;;  %v668_v11 = vmul.f32 %v2186_v5, %v2186_v5 }
 0x28d   :  { %v353_v15 = vsel %vm346_vm1, %v327_v14, 0.0  ;;  %v1485_v14 = vpack.i.bf16 %v1759_v12, %v1785_v18 }
 0x28e   :  { %v329_v17 = vpop.permute.xlu0 %328  ;;  %354 = vadd.xlane.f32.xlu0 %v353_v15 }
 0x28f   :  { %v356_v52 = vsel %vm346_vm1, %v329_v17, 0.0 }
 0x290   :  { %357 = vadd.xlane.f32.xlu2 %v356_v52 }
 0x298   :  { %360 = vadd.xlane.f32.xlu2 %v359_v62 }
 0x29a   :  { %v1467_v21 = vpop.permute.xlu2 %1466 }
 0x29b   :  { %v1469_v25 = vunpack.i.h.bf16 %v1467_v21  ;;  %v1468_v26 = vunpack.i.l.bf16 %v1467_v21 }
 0x29d   :  { %v647_v27 = vmax.f32 %v479_v23, %v1469_v25  ;;  %v648_v28 = vmax.f32 %v480_v24, %v1468_v26 }
 0x29f   :  { %v1490_v29 = vpack.i.bf16 %v647_v27, %v648_v28 }
 0x2a0   :  { %v333_v30 = vpop.permute.xlu1 %332 }
 0x2a1   :  { %v362_v47 = vsel %vm346_vm1, %v333_v30, 0.0 }
 0x2a2   :  { %363 = vadd.xlane.f32.xlu1 %v362_v47  ;;  %v337_v44 = vpop.permute.xlu2 %336 }
 0x2a3   :  { %v368_v34 = vsel %vm346_vm1, %v337_v44, 0.0 }
 0x2a8   :  { %v335_v32 = vpop.permute.xlu0 %334  ;;  %v2083_v9 = vpop.permute.xlu1 %1461 }
 0x2a9   :  { %v365_v56 = vsel %vm346_vm1, %v335_v32, 0.0 }
 0x2aa   :  { %366 = vadd.xlane.f32.xlu0 %v365_v56 }
 0x2b0   :  { %1481 = vrot.lane.b32.xlu2 %v1480_v57, %s1639_s29 }
 0x2b8   :  { %1491 = vrot.lane.b32.xlu2 %v1490_v29, %s1639_s29 }
 0x2ba   :  { %v1472_v33 = vpop.permute.xlu0 %1471 }
 0x2bb   :  { %v1474_v35 = vunpack.i.h.bf16 %v1472_v33  ;;  %v1473_v42 = vunpack.i.l.bf16 %v1472_v33 }
 0x2bd   :  { %v649_v38 = vmax.f32 %v481_v48, %v1474_v35  ;;  %v650_v40 = vmax.f32 %v482_v55, %v1473_v42 }
 0x2bf   :  { %v1495_v41 = vpack.i.bf16 %v649_v38, %v650_v40  ;;  %v1641_v38 = vmov 0.0  }
 0x2dd   :  { %v352_v51 = vpop.xlane.xlu1 %351 }
 0x2de   :  { %v372_v54 = vsub.f32 0.0, %v352_v51 }
 0x2e0   :  { %v380_v50 = vsub.f32 %v372_v54, %v1733_v6  ;;  %v671_v6 = vmul.f32 %v1715_v2, %v1715_v2 }
 0x2e1   :  { %369 = vadd.xlane.f32.xlu2 %v368_v34 }
 0x2e2   :  { %v389_v63 = vmul.f32 1.442695, %v380_v50  ;;  %v652_v45 = vsub.f32 0.0, %v380_v50  ;;  %v1475_v0 = vpack.i.bf16 %v671_v6, %v672_v59 }
 0x2e4   :  { %v349_v43 = vpop.xlane.xlu2 %348  ;;  %1604 = vpow2.f32 %v389_v63  ;;  %1476 = vrot.lane.b32.xlu1 %v1475_v0, %s1638_s22 }
 0x2e5   :  { %v371_v46 = vsub.f32 0.0, %v349_v43 }
 0x2e7   :  { %v379_v36 = vsub.f32 %v371_v46, %v1710_v1 }
 0x2e9   :  { %v387_v20 = vmul.f32 1.442695, %v379_v36  ;;  %v651_v37 = vsub.f32 0.0, %v379_v36 }
 0x2ea   :  { %v2088_v57 = vpop.eup %1604 }
 0x2eb   :  { %1606 = vpow2.f32 %v387_v20  ;;  %v1500_v53 = vpack.i.bf16 %v651_v37, %v652_v45  ;;  %v2096_v60 = vadd.f32 -1.0, %v2088_v57 }
 0x2ec   :  { %1486 = vrot.lane.b32.xlu1 %v1485_v14, %s1636_s4 }
 0x2ed   :  { %1501 = vrot.lane.b32.xlu0 %v1500_v53, %s1640_s23  ;;  %v660_v8 = vsub.f32 %v2096_v60, %v380_v50 }
 0x2f1   :  { %v2098_v1 = vpop.eup %1606 }
 0x2f2   :  { %v2101_v3 = vadd.f32 -1.0, %v2098_v1 }
 0x2f4   :  { %v659_v4 = vsub.f32 %v2101_v3, %v379_v36 }
 0x2f6   :  { %v2106_v10 = vpack.i.bf16 %v659_v4, %v660_v8 }
 0x2f9   :  { %1496 = vrot.lane.b32.xlu2 %v1495_v41, %s1639_s29 }
 0x301   :  { %v355_v15 = vpop.xlane.xlu0 %354 }
 0x302   :  { %v373_v17 = vsub.f32 0.0, %v355_v15 }
 0x303   :  { %v358_v52 = vpop.xlane.xlu2 %357 }
 0x304   :  { %v381_v58 = vsub.f32 %v373_v17, %v1759_v12  ;;  %v374_v49 = vsub.f32 0.0, %v358_v52 }
 0x306   :  { %v391_v62 = vmul.f32 1.442695, %v381_v58  ;;  %v382_v21 = vsub.f32 %v374_v49, %v1785_v18  ;;  %v653_v24 = vsub.f32 0.0, %v381_v58 }
 0x308   :  { %1608 = vpow2.f32 %v391_v62  ;;  %v393_v23 = vmul.f32 1.442695, %v382_v21  ;;  %v654_v25 = vsub.f32 0.0, %v382_v21 }
 0x30a   :  { %1610 = vpow2.f32 %v393_v23  ;;  %v1505_v26 = vpack.i.bf16 %v653_v24, %v654_v25 }
 0x30b   :  { %v361_v27 = vpop.xlane.xlu2 %360 }
 0x30c   :  { %v375_v28 = vsub.f32 0.0, %v361_v27  ;;  %1506 = vrot.lane.b32.xlu0 %v1505_v26, %s1640_s23 }
 0x30e   :  { %v2115_v29 = vpop.eup %1608  ;;  %v383_v30 = vsub.f32 %v375_v28, %v1715_v2 }
 0x30f   :  { %v1380_v12 = vadd.f32 -1.0, %v2115_v29 }
 0x310   :  { %v2119_v47 = vpop.eup %1610  ;;  %v395_v32 = vmul.f32 1.442695, %v383_v30  ;;  %v655_v34 = vsub.f32 0.0, %v383_v30 }
 0x311   :  { %v1381_v56 = vadd.f32 -1.0, %v2119_v47  ;;  %v413_v22 = vand.u32 2147483647, %v1380_v12  ;;  %v661_v31 = vsub.f32 %v1380_v12, %v381_v58 }
 0x312   :  { %1612 = vpow2.f32 %v395_v32 }
 0x313   :  { %v662_v33 = vsub.f32 %v1381_v56, %v382_v21  ;;  %v414_v48 = vand.u32 2147483647, %v1381_v56  ;;  %vm421_vm2 = vcmp.gt.f32.partialorder %v413_v22, 0.2  ;;  %v2138_v4 = vpop.permute.xlu2 %1481  ;;  %v411_v22 = vand.u32 2147483647, %v2101_v3 }
 0x314   :  { %v1388_v2 = vsel %vm421_vm2, 1.0, %v1641_v38  ;;  %v412_v3 = vand.u32 2147483647, %v2096_v60 }
 0x315   :  { %v364_v55 = vpop.xlane.xlu1 %363  ;;  %v1510_v35 = vpack.i.bf16 %v661_v31, %v662_v33  ;;  %vm422_vm3 = vcmp.gt.f32.partialorder %v414_v48, 0.2  ;;  %vm419_vm8 = vcmp.gt.f32.partialorder %v411_v22, 0.2  ;;  %v1443_v22 = vunpack.i.l.bf16 %v2003_v61 }
 0x316   :  { %v376_v42 = vsub.f32 0.0, %v364_v55  ;;  %v1389_v40 = vsel %vm422_vm3, 1.0, %v1641_v38  ;;  %v2160_v55 = vld [vmem:[%s2437_s0 + $0x10] sm:$0xff]  ;;  %vm420_vm9 = vcmp.gt.f32.partialorder %v412_v3, 0.2 }
 0x317   :  { %1511 = vrot.lane.b32.xlu2 %v1510_v35, %s1632_s15  ;;  %v1515_v41 = vpack.i.bf16 %v1388_v2, %v1389_v40  ;;  %v669_v35 = vmul.f32 %v2160_v55, %v2160_v55  ;;  %v1386_v2 = vsel %vm419_vm8, 1.0, %v1641_v38  ;;  %v1387_v40 = vsel %vm420_vm9, 1.0, %v1641_v38 }
 0x318   :  { %v384_v44 = vsub.f32 %v376_v42, %v1738_v7  ;;  %v2127_v51 = vpop.eup %1612 }
 0x319   :  { %1516 = vrot.lane.b32.xlu0 %v1515_v41, %s1634_s17  ;;  %v1382_v63 = vadd.f32 -1.0, %v2127_v51  ;;  %v1560_v41 = vpack.i.bf16 %v1386_v2, %v1387_v40  ;;  %v1448_v2 = vunpack.i.l.bf16 %v2031_v39 }
 0x31a   :  { %v397_v54 = vmul.f32 1.442695, %v384_v44  ;;  %v656_v50 = vsub.f32 0.0, %v384_v44 }
 0x31b   :  { %v415_v46 = vand.u32 2147483647, %v1382_v63  ;;  %v663_v37 = vsub.f32 %v1382_v63, %v383_v30  ;;  %v2141_v17 = vpop.permute.xlu2 %1491 }
 0x31c   :  { %1614 = vpow2.f32 %v397_v54  ;;  %v1520_v43 = vpack.i.bf16 %v655_v34, %v656_v50 }
 0x31d   :  { %vm423_vm4 = vcmp.gt.f32.partialorder %v415_v46, 0.2  ;;  %v367_v8 = vpop.xlane.xlu0 %366 }
 0x31e   :  { %v1390_v6 = vsel %vm423_vm4, 1.0, %v1641_v38  ;;  %v377_v14 = vsub.f32 0.0, %v367_v8 }
 0x320   :  { %v385_v15 = vsub.f32 %v377_v14, %v1764_v13  ;;  %v1493_v14 = vunpack.i.l.bf16 %v2141_v17 }
 0x321   :  { %1521 = vrot.lane.b32.xlu0 %v1520_v43, %s1640_s23 }
 0x322   :  { %v2131_v36 = vpop.eup %1614  ;;  %v399_v52 = vmul.f32 1.442695, %v385_v15  ;;  %v657_v24 = vsub.f32 0.0, %v385_v15 }
 0x323   :  { %v1383_v20 = vadd.f32 -1.0, %v2131_v36 }
 0x324   :  { %1616 = vpow2.f32 %v399_v52 }
 0x325   :  { %v664_v7 = vsub.f32 %v1383_v20, %v384_v44  ;;  %v416_v45 = vand.u32 2147483647, %v1383_v20 }
 0x327   :  { %v1525_v53 = vpack.i.bf16 %v663_v37, %v664_v7  ;;  %vm424_vm5 = vcmp.gt.f32.partialorder %v416_v45, 0.2  ;;  %v1464_v7 = vunpack.i.h.bf16 %v2083_v9 }
 0x328   :  { %v1391_v59 = vsel %vm424_vm5, 1.0, %v1641_v38 }
 0x329   :  { %1526 = vrot.lane.b32.xlu2 %v1525_v53, %s1632_s15  ;;  %v1530_v0 = vpack.i.bf16 %v1390_v6, %v1391_v59  ;;  %v1494_v59 = vunpack.i.h.bf16 %v2141_v17 }
 0x32a   :  { %v2144_v21 = vpop.eup %1616 }
 0x32b   :  { %1531 = vrot.lane.b32.xlu0 %v1530_v0, %s1634_s17  ;;  %v1384_v27 = vadd.f32 -1.0, %v2144_v21 }
 0x32d   :  { %v417_v13 = vand.u32 2147483647, %v1384_v27  ;;  %v665_v12 = vsub.f32 %v1384_v27, %v385_v15 }
 0x32f   :  { %vm425_vm6 = vcmp.gt.f32.partialorder %v417_v13, 0.2 }
 0x330   :  { %v1392_v31 = vsel %vm425_vm6, 1.0, %v1641_v38 }
 0x354   :  { %v370_v58 = vpop.xlane.xlu2 %369 }
 0x355   :  { %v378_v49 = vsub.f32 0.0, %v370_v58  ;;  %v1463_v58 = vunpack.i.l.bf16 %v2083_v9 }
 0x357   :  { %v386_v62 = vsub.f32 %v378_v49, %v1790_v19 }
 0x359   :  { %v401_v23 = vmul.f32 1.442695, %v386_v62  ;;  %v658_v25 = vsub.f32 0.0, %v386_v62 }
 0x35b   :  { %1618 = vpow2.f32 %v401_v23  ;;  %v1535_v26 = vpack.i.bf16 %v657_v24, %v658_v25 }
 0x35c   :  { %v1497_v50 = vpop.permute.xlu2 %1496 }
 0x35d   :  { %1536 = vrot.lane.b32.xlu2 %v1535_v26, %s1640_s23  ;;  %v2216_v26 = vpop.permute.xlu1 %1476  ;;  %v1499_v40 = vunpack.i.h.bf16 %v1497_v50  ;;  %s1644_s23 = smov 13  }
 0x35f   :  { %v2194_v44 = vpop.permute.xlu0 %1501 }
 0x361   :  { %v2148_v28 = vpop.eup %1618 }
 0x362   :  { %v1385_v30 = vadd.f32 -1.0, %v2148_v28 }
 0x364   :  { %v666_v32 = vsub.f32 %v1385_v30, %v386_v62  ;;  %v418_v56 = vand.u32 2147483647, %v1385_v30 }
 0x365   :  { %1541 = vrot.lane.b32.xlu2 %v2106_v10, %s1632_s15  ;;  %v670_v10 = vmul.f32 %v1785_v18, %v1785_v18  ;;  %v2179_v18 = vld [vmem:[%s2437_s0] sm:$0xff]  ;;  %v2218_v27 = vpop.permute.xlu1 %1486 }
 0x366   :  { %v1545_v19 = vpack.i.bf16 %v665_v12, %v666_v32  ;;  %vm426_vm7 = vcmp.gt.f32.partialorder %v418_v56, 0.2  ;;  %v667_v60 = vmul.f32 %v2179_v18, %v2179_v18 }
 0x367   :  { %v1393_v33 = vsel %vm426_vm7, 1.0, %v1641_v38  ;;  %v1550_v42 = vpack.i.bf16 %v669_v35, %v670_v10  ;;  %vm1364_vm7 = vcmask 44032  }
 0x368   :  { %1546 = vrot.lane.b32.xlu1 %v1545_v19, %s1632_s15  ;;  %v1555_v48 = vpack.i.bf16 %v1392_v31, %v1393_v33  ;;  %v1575_v38 = vpack.i.bf16 %v667_v60, %v668_v11  ;;  %v1444_v19 = vunpack.i.h.bf16 %v2003_v61  ;;  %v1449_v31 = vunpack.i.h.bf16 %v2031_v39 }
 0x369   :  { %v1478_v11 = vunpack.i.l.bf16 %v2216_v26 }
 0x36a   :  { %1556 = vrot.lane.b32.xlu0 %v1555_v48, %s1634_s17 }
 0x36d   :  { %1566 = vrot.lane.b32.xlu2 %v1565_v16, %s1639_s29  ;;  %v1570_v16 = vpack.i.bf16 %v2179_v18, %v2186_v5 }
 0x370   :  { %1551 = vrot.lane.b32.xlu1 %v1550_v42, %s1638_s22 }
 0x371   :  { %v2200_v63 = vpop.permute.xlu2 %1511 }
 0x372   :  { %1561 = vrot.lane.b32.xlu0 %v1560_v41, %s1634_s17  ;;  %v1498_v41 = vunpack.i.l.bf16 %v1497_v50  ;;  %s1646_s17 = smov 125  }
 0x378   :  { %1571 = vrot.lane.b32.xlu1 %v1570_v16, %s1636_s4 }
 0x37a   :  { %1576 = vrot.lane.b32.xlu0 %v1575_v38, %s1638_s22 }
 0x37e   :  { %v2196_v54 = vpop.permute.xlu0 %1506 }
 0x37f   :  { %v1508_v60 = vunpack.i.l.bf16 %v2196_v54 }
 0x383   :  { %v1527_v46 = vpop.permute.xlu2 %1526 }
 0x384   :  { %v1529_v45 = vunpack.i.h.bf16 %v1527_v46  ;;  %v1528_v53 = vunpack.i.l.bf16 %v1527_v46  ;;  %v1509_v46 = vunpack.i.h.bf16 %v2196_v54 }
 0x38b   :  { %v2198_v34 = vpop.permute.xlu0 %1516 }
 0x38c   :  { %v1518_v61 = vunpack.i.l.bf16 %v2198_v34  ;;  %v1519_v50 = vunpack.i.h.bf16 %v2198_v34 }
 0x393   :  { %v1522_v43 = vpop.permute.xlu0 %1521 }
 0x394   :  { %v1524_v20 = vunpack.i.h.bf16 %v1522_v43  ;;  %v1523_v37 = vunpack.i.l.bf16 %v1522_v43  ;;  %v1513_v43 = vunpack.i.l.bf16 %v2200_v63 }
 0x396   :  { %v864_v15 = vsel %vm859_vm10, %v1524_v20, %v1529_v45  ;;  %v865_v52 = vsel %vm859_vm10, %v1523_v37, %v1528_v53  ;;  %v1514_v45 = vunpack.i.h.bf16 %v2200_v63  ;;  %v863_v53 = vsel %vm859_vm10, %v1508_v60, %v1513_v43 }
 0x397   :  { %v872_v34 = vsel %vm868_vm11, %v863_v53, %v1518_v61  ;;  %v1479_v63 = vunpack.i.h.bf16 %v2216_v26  ;;  %v1227_v53 = vmax.f32 %v2144_v21, 0.8 }
 0x39d   :  { %v1532_v6 = vpop.permute.xlu0 %1531 }
 0x39e   :  { %v1534_v0 = vunpack.i.h.bf16 %v1532_v6  ;;  %v1533_v8 = vunpack.i.l.bf16 %v1532_v6 }
 0x3a0   :  { %v873_v49 = vsel %vm868_vm11, %v864_v15, %v1534_v0  ;;  %v874_v62 = vsel %vm868_vm11, %v865_v52, %v1533_v8  ;;  %v1484_v0 = vunpack.i.h.bf16 %v2138_v4  ;;  %v1483_v8 = vunpack.i.l.bf16 %v2138_v4 }
 0x3a1   :  { %v883_v23 = vsel %vm877_vm12, %v874_v62, %v1493_v14  ;;  %v882_v24 = vsel %vm877_vm12, %v873_v49, %v1494_v59  ;;  %v1503_v14 = vunpack.i.l.bf16 %v2194_v44  ;;  %v862_v15 = vsel %vm859_vm10, %v1509_v46, %v1514_v45 }
 0x3a2   :  { %v891_v25 = vsel %vm346_vm1, %v883_v23, %v1463_v58  ;;  %v2214_v17 = vsel %vm346_vm1, %v882_v24, %v1464_v7  ;;  %v871_v49 = vsel %vm868_vm11, %v862_v15, %v1519_v50  ;;  %v1488_v62 = vunpack.i.l.bf16 %v2218_v27 }
 0x3b7   :  { %v1537_v13 = vpop.permute.xlu2 %1536 }
 0x3b8   :  { %v1539_v30 = vunpack.i.h.bf16 %v1537_v13  ;;  %v1538_v12 = vunpack.i.l.bf16 %v1537_v13 }
 0x3bf   :  { %v1542_v48 = vpop.permute.xlu2 %1541 }
 0x3c0   :  { %v1543_v52 = vunpack.i.l.bf16 %v1542_v48  ;;  %v1544_v23 = vunpack.i.h.bf16 %v1542_v48 }
 0x3c7   :  { %v1567_v26 = vpop.permute.xlu2 %1566 }
 0x3da   :  { %v1547_v9 = vpop.permute.xlu1 %1546 }
 0x3db   :  { %v1549_v32 = vunpack.i.h.bf16 %v1547_v9  ;;  %v1548_v56 = vunpack.i.l.bf16 %v1547_v9  ;;  %v900_v9 = vsel %vm894_vm13, %v891_v25, %v1478_v11 }
 0x3dc   :  { %v1557_v33 = vpop.permute.xlu0 %1556 }
 0x3dd   :  { %v866_v35 = vsel %vm859_vm10, %v1539_v30, %v1549_v32  ;;  %v867_v10 = vsel %vm859_vm10, %v1538_v12, %v1548_v56  ;;  %v1559_v3 = vunpack.i.h.bf16 %v1557_v33  ;;  %v1558_v42 = vunpack.i.l.bf16 %v1557_v33 }
 0x3de   :  { %v881_v30 = vsel %vm877_vm12, %v872_v34, %v1483_v8  ;;  %v1504_v12 = vunpack.i.h.bf16 %v2194_v44  ;;  %v1489_v32 = vunpack.i.h.bf16 %v2218_v27  ;;  %v861_v56 = vsel %vm859_vm10, %v1503_v14, %v1543_v52 }
 0x3df   :  { %v875_v16 = vsel %vm868_vm11, %v866_v35, %v1559_v3  ;;  %v876_v38 = vsel %vm868_vm11, %v867_v10, %v1558_v42  ;;  %v889_v48 = vsel %vm346_vm1, %v881_v30, %v1488_v62  ;;  %v1568_v44 = vunpack.i.l.bf16 %v1567_v26 }
 0x3e0   :  { %v885_v20 = vsel %vm877_vm12, %v876_v38, %v1498_v41  ;;  %v884_v39 = vsel %vm877_vm12, %v875_v16, %v1499_v40  ;;  %v860_v33 = vsel %vm859_vm10, %v1504_v12, %v1544_v23  ;;  %v1569_v3 = vunpack.i.h.bf16 %v1567_v26 }
 0x3e1   :  { %v893_v37 = vsel %vm346_vm1, %v885_v20, %v1443_v22  ;;  %v892_v7 = vsel %vm346_vm1, %v884_v39, %v1444_v19  ;;  %v899_v22 = vsel %vm894_vm13, %v2214_v17, %v1479_v63  ;;  %v2273_v20 = vld [vmem:[%s2444_s8] sm:$0xf]  ;;  %s1643_s8 = smov 123  }
 0x3e2   :  { %v1552_v6 = vpop.permute.xlu1 %1551  ;;  %v902_v59 = vsel %vm894_vm13, %v893_v37, %v1448_v2  ;;  %v901_v54 = vsel %vm894_vm13, %v892_v7, %v1449_v31  ;;  %v880_v31 = vsel %vm877_vm12, %v871_v49, %v1484_v0  ;;  %v1224_v0 = vmax.f32 %v2119_v47, 0.8 }
 0x3e3   :  { %916 = vmatpush.msra.mxu3 %v902_v59  ;;  %v1553_v13 = vunpack.i.l.bf16 %v1552_v6  ;;  %v1554_v19 = vunpack.i.h.bf16 %v1552_v6  ;;  %v888_v17 = vsel %vm346_vm1, %v880_v31, %v1489_v32  ;;  %v1235_v6 = vmin.f32 %v1227_v53, 1.2 }
 0x3e4   :  { %v1562_v58 = vpop.permute.xlu0 %1561  ;;  %v1226_v59 = vmax.f32 %v2131_v36, 0.8  ;;  %v1232_v8 = vmin.f32 %v1224_v0, 1.2  ;;  %v1223_v0 = vmax.f32 %v2115_v29, 0.8 }
 0x3e5   :  { %v1563_v24 = vunpack.i.l.bf16 %v1562_v58  ;;  %917 = vmatpush.msra.mxu3 %v901_v54  ;;  %v1564_v4 = vunpack.i.h.bf16 %v1562_v58  ;;  %v898_v10 = vsel %vm894_vm13, %v889_v48, %v1553_v13  ;;  %v897_v41 = vsel %vm894_vm13, %v888_v17, %v1554_v19  ;;  %v971_v17 = vld [vmem:[%s2445_s9 + $0x18] sm:$0xff] }
 0x3e6   :  { %v1234_v54 = vmin.f32 %v1226_v59, 1.2 }
 0x3e7   :  { %918 = vmatpush.msra.mxu3 %v900_v9  ;;  %v870_v25 = vsel %vm868_vm11, %v861_v56, %v1563_v24  ;;  %v869_v27 = vsel %vm868_vm11, %v860_v33, %v1564_v4 }
 0x3e8   :  { %v879_v60 = vsel %vm877_vm12, %v870_v25, %v1568_v44  ;;  %v878_v38 = vsel %vm877_vm12, %v869_v27, %v1569_v3  ;;  %v968_v27 = vld [vmem:[%s2445_s9] sm:$0xff]  ;;  %v969_v3 = vld [vmem:[%s2445_s9 + $0x8] sm:$0xff] }
 0x3e9   :  { %919 = vmatpush.msra.mxu3 %v899_v22 }
 0x3ea   :  { %v1572_v35 = vpop.permute.xlu1 %1571 }
 0x3eb   :  { %v1574_v42 = vunpack.i.h.bf16 %v1572_v35  ;;  %v1573_v2 = vunpack.i.l.bf16 %v1572_v35  ;;  %920 = vmatpush.msra.mxu3 %v898_v10  ;;  %v1228_v35 = vmax.f32 %v2148_v28, 0.8 }
 0x3ec   :  { %v1577_v40 = vpop.permute.xlu0 %1576 }
 0x3ed   :  { %v1579_v11 = vunpack.i.h.bf16 %v1577_v40  ;;  %v1578_v61 = vunpack.i.l.bf16 %v1577_v40  ;;  %921 = vmatpush.msra.mxu3 %v897_v41  ;;  %v887_v16 = vsel %vm346_vm1, %v879_v60, %v1573_v2  ;;  %v886_v43 = vsel %vm346_vm1, %v878_v38, %v1574_v42  ;;  %v970_v42 = vld [vmem:[%s2445_s9 + $0x10] sm:$0xff]  ;;  %v972_v40 = vld [vmem:[%s2445_s9 + $0x20] sm:$0xff]  ;;  %v975_v41 = vld [vmem:[%s2445_s9 + $0x38] sm:$0xff] }
 0x3ee   :  { %v1236_v10 = vmin.f32 %v1228_v35, 1.2 }
 0x3ef   :  { %v896_v46 = vsel %vm894_vm13, %v887_v16, %v1578_v61  ;;  %v895_v39 = vsel %vm894_vm13, %v886_v43, %v1579_v11 }
 0x3f0   :  { %922 = vmatpush.msra.mxu3 %v896_v46 }
 0x3f2   :  { %923 = vmatpush.msra.mxu3 %v895_v39 }
 0x3f3   :  { %1402 = vmatmul.msk.f32.vlgmr.msra.gmra.mxu3 %vm904_vm14, %v2273_v20 }
 0x476   :  { %v2278_v50 = vpop.f32.mrf.mxu3 }
 0x477   :  { %v2281_v37 = vmul.f32 0.0625, %v2278_v50 }
 0x479   :  { %977 = vrot.lane.b32.xlu1 %v2281_v37, %s1642_s28  ;;  %v931_v7 = vmul.f32 16.0, %v2281_v37 }
 0x47b   :  { %v932_v45 = vmul.f32 %v931_v7, %v2281_v37 }
 0x47d   :  { %934 = vrot.lane.b32.xlu2 %v932_v45, %s1633_s16 }
 0x481   :  { %1203 = vrot.lane.b32.xlu1 %v2148_v28, %s1633_s16  ;;  %v1225_v28 = vmax.f32 %v2127_v51, 0.8 }
 0x483   :  { %v1233_v2 = vmin.f32 %v1225_v28, 1.2 }
 0x485   :  { %1257 = vrot.lane.b32.xlu2 %v1235_v6, %s1633_s16 }
 0x489   :  { %1255 = vrot.lane.b32.xlu1 %v1234_v54, %s1633_s16 }
 0x48d   :  { %1199 = vrot.lane.b32.xlu2 %v2131_v36, %s1633_s16 }
 0x491   :  { %1197 = vrot.lane.b32.xlu1 %v2127_v51, %s1633_s16  ;;  %v973_v51 = vld [vmem:[%s2445_s9 + $0x28] sm:$0xff] }
 0x495   :  { %1251 = vrot.lane.b32.xlu2 %v1232_v8, %s1633_s16  ;;  %v1231_v8 = vmin.f32 %v1223_v0, 1.2 }
 0x4d7   :  { %v935_v34 = vpop.permute.xlu2 %934 }
 0x4d8   :  { %v937_v14 = vsub.f32 %v2278_v50, %v935_v34 }
 0x4da   :  { %v938_v15 = vmax.f32 %v937_v14, 0.0 }
 0x4dc   :  { %v939_v63 = vmul.f32 0.06666667, %v938_v15  ;;  %v1221_v15 = vmax.f32 %v2098_v1, 0.8 }
 0x4de   :  { %1620 = vrsqrt.f32 %v939_v63  ;;  %vm947_vm0 = vcmp.eq.f32.partialorder %v939_v63, inf  ;;  %v950_v4 = vand.u32 2147483648, %v939_v63  ;;  %vm949_vm2 = vcmp.eq.f32.partialorder %v939_v63, 0.0 }
 0x4e4   :  { %v1621_v52 = vpop.eup %1620 }
 0x4e5   :  { %v941_v58 = vmul.f32 %v1621_v52, %v939_v63 }
 0x4e7   :  { %v942_v49 = vmul.f32 %v1621_v52, %v941_v58  ;;  %v1222_v58 = vmax.f32 %v2088_v57, 0.8 }
 0x4e9   :  { %v943_v62 = vmul.f32 0.5, %v942_v49  ;;  %v1230_v49 = vmin.f32 %v1222_v58, 1.2 }
 0x4eb   :  { %v978_v36 = vpop.permute.xlu1 %977  ;;  %v944_v23 = vsub.f32 1.5, %v943_v62 }
 0x4ec   :  { %1403 = vmatpush.msk.msrb.mxu3 %vm1003_vm15, %v978_v36 }
 0x4ed   :  { %v945_v24 = vmul.f32 %v1621_v52, %v944_v23  ;;  %1404 = vmatmul.msk.f32.vlgmr.msrb.gmra.mxu3 %vm346_vm1, %v968_v27  ;;  %v2373_v52 = vpop.permute.xlu2 %1257 }
 0x4ef   :  { %v946_v13 = vmul.f32 %v945_v24, %v939_v63 }
 0x4f1   :  { %v948_v9 = vsel %vm947_vm0, %v939_v63, %v946_v13  ;;  %v1229_v63 = vmin.f32 %v1221_v15, 1.2 }
 0x4f2   :  { %v951_v30 = vsel %vm949_vm2, %v950_v4, %v948_v9 }
 0x4f3   :  { %v952_v12 = vadd.f32 1e-08, %v951_v30  ;;  %v2380_v36 = vpop.permute.xlu1 %1203 }
 0x4f5   :  { %1622 = vrcp.f32 %v952_v12  ;;  %v964_v19 = vand.u32 2147483648, %v952_v12  ;;  %v962_v31 = vand.u32 2147483647, %v952_v12  ;;  %vm958_vm4 = vweird.f32 %v952_v12  ;;  %1405 = vmatmul.msk.f32.gmra.mxu3 %vm346_vm1, %v969_v3  ;;  %v1200_v62 = vpop.permute.xlu2 %1199 }
 0x4f7   :  { %v965_v25 = vor.u32 1.1754944e-38, %v964_v19  ;;  %vm963_vm6 = vcmp.eq.f32.partialorder %v962_v31, 8.507059e+37 }
 0x4fb   :  { %v1623_v32 = vpop.eup %1622  ;;  %v1256_v24 = vpop.permute.xlu1 %1255 }
 0x4fc   :  { %v954_v26 = vmul.f32 %v1623_v32, %v952_v12  ;;  %vm959_vm3 = vweird.f32 %v1623_v32 }
 0x4fd   :  { %vm960_vm5 = vmor %vm958_vm4, %vm959_vm3  ;;  %1406 = vmatmul.msk.f32.gmra.mxu3 %vm346_vm1, %v970_v42  ;;  %v2382_v23 = vpop.permute.xlu2 %1251 }
 0x4fe   :  { %v955_v56 = vsub.f32 1.0, %v954_v26 }
 0x500   :  { %v956_v22 = vmul.f32 %v1623_v32, %v955_v56 }
 0x502   :  { %v957_v33 = vadd.f32 %v1623_v32, %v956_v22 }
 0x503   :  { %v1198_v4 = vpop.permute.xlu1 %1197 }
 0x504   :  { %v961_v48 = vsel %vm960_vm5, %v1623_v32, %v957_v33 }
 0x505   :  { %v966_v44 = vsel %vm963_vm6, %v965_v25, %v961_v48  ;;  %1407 = vmatmul.msk.f32.gmra.mxu3 %vm346_vm1, %v971_v17  ;;  %v1627_v48 = vld [vmem:[%s2437_s0 + $0x28] sm:$0xff] }
 0x506   :  { %1048 = vrot.lane.b32.xlu0 %v966_v44, %s1643_s8 }
 0x50d   :  { %1408 = vmatmul.msk.f32.gmra.mxu3 %vm346_vm1, %v972_v40 }
 0x50e   :  { %1259 = vrot.lane.b32.xlu0 %v1236_v10, %s1633_s16  ;;  %v1628_v10 = vld [vmem:[%s2437_s0 + $0x20] sm:$0xff] }
 0x515   :  { %1409 = vmatmul.msk.f32.gmra.mxu3 %vm346_vm1, %v973_v51 }
 0x516   :  { %1201 = vrot.lane.b32.xlu0 %v2144_v21, %s1633_s16  ;;  %v974_v21 = vld [vmem:[%s2445_s9 + $0x30] sm:$0xff] }
 0x51d   :  { %1410 = vmatmul.msk.f32.gmra.mxu3 %vm346_vm1, %v974_v21 }
 0x51e   :  { %1253 = vrot.lane.b32.xlu0 %v1233_v2, %s1633_s16 }
 0x525   :  { %1411 = vmatmul.msk.f32.gmra.mxu3 %vm346_vm1, %v975_v41 }
 0x526   :  { %1195 = vrot.lane.b32.xlu0 %v2119_v47, %s1633_s16 }
 0x570   :  { %v1023_v60 = vpop.f32.mrf.mxu3 }
 0x571   :  { %1101 = vrot.lane.b32.xlu2 %v1023_v60, %s1644_s23 }
 0x578   :  { %v1049_v47 = vpop.permute.xlu0 %1048  ;;  %v1026_v11 = vpop.f32.mrf.mxu3 }
 0x579   :  { %1412 = vmatpush.msk.msrb.mxu0 %vm1003_vm15, %v1049_v47  ;;  %1103 = vrot.lane.b32.xlu0 %v1026_v11, %s1644_s23  ;;  %v929_v11 = vmul.f32 0.5, %v2278_v50  ;;  %v1630_v50 = vld [vmem:[%s2437_s0 + $0x18] sm:$0xff] }
 0x57a   :  { %1413 = vmatmul.msk.f32.vlgmr.msrb.gmra.mxu0 %vm346_vm1, %v968_v27 }
 0x580   :  { %v1029_v61 = vpop.f32.mrf.mxu3  ;;  %v2386_v13 = vpop.permute.xlu0 %1259 }
 0x581   :  { %1105 = vrot.lane.b32.xlu1 %v1029_v61, %s1644_s23 }
 0x582   :  { %1414 = vmatmul.msk.f32.gmra.mxu0 %vm346_vm1, %v969_v3 }
 0x588   :  { %v1032_v16 = vpop.f32.mrf.mxu3  ;;  %v1202_v30 = vpop.permute.xlu0 %1201 }
 0x589   :  { %1107 = vrot.lane.b32.xlu2 %v1032_v16, %s1644_s23  ;;  %v930_v16 = vmul.f32 0.0625, %v929_v11 }
 0x58a   :  { %1415 = vmatmul.msk.f32.gmra.mxu0 %vm346_vm1, %v970_v42 }
 0x590   :  { %v1035_v38 = vpop.f32.mrf.mxu3  ;;  %v1254_v32 = vpop.permute.xlu0 %1253 }
 0x591   :  { %1109 = vrot.lane.b32.xlu0 %v1035_v38, %s1644_s23 }
 0x592   :  { %1416 = vmatmul.msk.f32.gmra.mxu0 %vm346_vm1, %v971_v17 }
 0x598   :  { %v1038_v43 = vpop.f32.mrf.mxu3  ;;  %v1196_v56 = vpop.permute.xlu0 %1195 }
 0x599   :  { %1111 = vrot.lane.b32.xlu2 %v1038_v43, %s1644_s23 }
 0x59a   :  { %1417 = vmatmul.msk.f32.gmra.mxu0 %vm346_vm1, %v972_v40 }
 0x5a0   :  { %v1041_v46 = vpop.f32.mrf.mxu3 }
 0x5a1   :  { %1113 = vrot.lane.b32.xlu1 %v1041_v46, %s1644_s23  ;;  %v1338_v46 = vmul.f32 0.5, %v930_v16 }
 0x5a2   :  { %1418 = vmatmul.msk.f32.gmra.mxu0 %vm346_vm1, %v973_v51 }
 0x5a8   :  { %v1044_v39 = vpop.f32.mrf.mxu3 }
 0x5a9   :  { %1115 = vrot.lane.b32.xlu2 %v1044_v39, %s1644_s23  ;;  %v1629_v39 = vld [vmem:[%s2437_s0 + $0x30] sm:$0xff] }
 0x5aa   :  { %1419 = vmatmul.msk.f32.gmra.mxu0 %vm346_vm1, %v974_v21 }
 0x5b2   :  { %1420 = vmatmul.msk.f32.gmra.mxu0 %vm346_vm1, %v975_v41 }
 0x5eb   :  { %v2388_v31 = vpop.permute.xlu0 %1103 }
 0x5f3   :  { %v1106_v12 = vpop.permute.xlu1 %1105 }
 0x5f7   :  { %v1069_v7 = vpop.f32.mrf.mxu0 }
 0x5f8   :  { %1141 = vrot.lane.b32.xlu1 %v1069_v7, %s1644_s23 }
 0x5ff   :  { %v1072_v45 = vpop.f32.mrf.mxu0 }
 0x600   :  { %1143 = vrot.lane.b32.xlu1 %v1072_v45, %s1644_s23 }
 0x603   :  { %v1110_v35 = vpop.permute.xlu0 %1109 }
 0x604   :  { %v1129_v3 = vsub.f32 %v1628_v10, %v1110_v35 }
 0x607   :  { %v1075_v53 = vpop.f32.mrf.mxu0 }
 0x608   :  { %1145 = vrot.lane.b32.xlu2 %v1075_v53, %s1644_s23 }
 0x60f   :  { %v1078_v6 = vpop.f32.mrf.mxu0 }
 0x610   :  { %1147 = vrot.lane.b32.xlu0 %v1078_v6, %s1644_s23  ;;  %v1127_v6 = vsub.f32 %v2160_v55, %v1106_v12 }
 0x617   :  { %v1081_v59 = vpop.f32.mrf.mxu0 }
 0x618   :  { %1149 = vrot.lane.b32.xlu1 %v1081_v59, %s1644_s23  ;;  %v1631_v59 = vld [vmem:[%s2437_s0 + $0x38] sm:$0xff]  ;;  %s1648_s0 = smov 5  }
 0x61f   :  { %v1084_v54 = vpop.f32.mrf.mxu0 }
 0x620   :  { %1151 = vrot.lane.b32.xlu2 %v1084_v54, %s1644_s23 }
 0x627   :  { %v1087_v34 = vpop.f32.mrf.mxu0 }
 0x628   :  { %1249 = vrot.lane.b32.xlu2 %v1231_v8, %s1633_s16  ;;  %1153 = vrot.lane.b32.xlu1 %v1087_v34, %s1644_s23 }
 0x62f   :  { %v1090_v14 = vpop.f32.mrf.mxu0 }
 0x630   :  { %1189 = vrot.lane.b32.xlu2 %v2098_v1, %s1633_s16  ;;  %1191 = vrot.lane.b32.xlu1 %v2088_v57, %s1633_s16  ;;  %v2384_v1 = vpop.permute.xlu2 %1101  ;;  %v1114_v57 = vpop.permute.xlu1 %1113 }
 0x631   :  { %1155 = vrot.lane.b32.xlu0 %v1090_v14, %s1644_s23  ;;  %v1131_v7 = vsub.f32 %v1629_v39, %v1114_v57  ;;  %v1125_v12 = vsub.f32 %v2179_v18, %v2384_v1 }
 0x638   :  { %1245 = vrot.lane.b32.xlu1 %v1229_v63, %s1633_s16  ;;  %v1108_v9 = vpop.permute.xlu2 %1107 }
 0x639   :  { %1193 = vrot.lane.b32.xlu0 %v2115_v29, %s1633_s16  ;;  %v1128_v53 = vsub.f32 %v1630_v50, %v1108_v9 }
 0x640   :  { %v1112_v29 = vpop.permute.xlu2 %1111 }
 0x641   :  { %1247 = vrot.lane.b32.xlu0 %v1230_v49, %s1633_s16  ;;  %v1130_v44 = vsub.f32 %v1627_v48, %v1112_v29 }
 0x648   :  { %v1116_v26 = vpop.permute.xlu2 %1115 }
 0x649   :  { %v1132_v54 = vsub.f32 %v1631_v59, %v1116_v26 }
 0x662   :  { %v1146_v22 = vpop.permute.xlu2 %1145 }
 0x663   :  { %v1167_v15 = vmul.f32 %v1146_v22, %v1127_v6 }
 0x665   :  { %v1175_v29 = vsub.f32 0.0, %v1167_v15 }
 0x66a   :  { %v1142_v19 = vpop.permute.xlu1 %1141 }
 0x672   :  { %v2390_v33 = vpop.permute.xlu1 %1143 }
 0x67a   :  { %v1152_v25 = vpop.permute.xlu2 %1151 }
 0x67b   :  { %v1170_v27 = vmul.f32 %v1152_v25, %v1130_v44 }
 0x67d   :  { %v1178_v42 = vsub.f32 0.0, %v1170_v27 }
 0x67f   :  { %v1218_v17 = vmul.f32 %v1200_v62, %v1178_v42  ;;  %v1274_v40 = vmul.f32 %v1256_v24, %v1178_v42 }
 0x681   :  { %v1282_v47 = vmax.f32 %v1218_v17, %v1274_v40 }
 0x682   :  { %v1148_v38 = vpop.permute.xlu0 %1147  ;;  %v1250_v55 = vpop.permute.xlu2 %1249 }
 0x683   :  { %v1168_v0 = vmul.f32 %v1148_v38, %v1128_v53  ;;  %v1271_v25 = vmul.f32 %v1250_v55, %v1175_v29 }
 0x685   :  { %v1176_v58 = vsub.f32 0.0, %v1168_v0 }
 0x687   :  { %v1272_v57 = vmul.f32 %v2382_v23, %v1176_v58 }
 0x68a   :  { %v1150_v28 = vpop.permute.xlu1 %1149  ;;  %v1190_v23 = vpop.permute.xlu2 %1189 }
 0x68b   :  { %v1169_v2 = vmul.f32 %v1150_v28, %v1129_v3 }
 0x68d   :  { %v1177_v51 = vsub.f32 0.0, %v1169_v2 }
 0x68f   :  { %v1217_v21 = vmul.f32 %v1198_v4, %v1177_v51  ;;  %v1273_v41 = vmul.f32 %v1254_v32, %v1177_v51  ;;  %v1216_v32 = vmul.f32 %v1196_v56, %v1176_v58 }
 0x691   :  { %v1281_v60 = vmax.f32 %v1217_v21, %v1273_v41 }
 0x693   :  { %v1585_v61 = vpack.i.bf16 %v1281_v60, %v1282_v47 }
 0x695   :  { %1586 = vrot.lane.b32.xlu2 %v1585_v61, %s1645_s3 }
 0x69a   :  { %v1154_v43 = vpop.permute.xlu1 %1153 }
 0x69b   :  { %v1171_v45 = vmul.f32 %v1154_v43, %v1131_v7 }
 0x69d   :  { %1340 = vrot.lane.b32.xlu2 %v1338_v46, %s1646_s17  ;;  %v1179_v8 = vsub.f32 0.0, %v1171_v45 }
 0x69f   :  { %v1219_v49 = vmul.f32 %v1202_v30, %v1179_v8  ;;  %v1275_v62 = vmul.f32 %v2373_v52, %v1179_v8  ;;  %v1165_v52 = vmul.f32 %v1142_v19, %v1125_v12 }
 0x6a1   :  { %v1283_v26 = vmax.f32 %v1219_v49, %v1275_v62  ;;  %v1173_v1 = vsub.f32 0.0, %v1165_v52 }
 0x6a2   :  { %v1192_v63 = vpop.permute.xlu1 %1191 }
 0x6a3   :  { %v1156_v34 = vpop.permute.xlu0 %1155 }
 0x6a4   :  { %v1172_v14 = vmul.f32 %v1156_v34, %v1132_v54 }
 0x6a5   :  { %1352 = vrot.lane.b32.xlu2 %v2281_v37, %s1647_s11  ;;  %v1126_v37 = vsub.f32 %v2186_v5, %v2388_v31  ;;  %v1213_v31 = vmul.f32 %v1190_v23, %v1173_v1 }
 0x6a6   :  { %v1180_v24 = vsub.f32 0.0, %v1172_v14 }
 0x6a8   :  { %v1220_v4 = vmul.f32 %v2380_v36, %v1180_v24  ;;  %v1276_v9 = vmul.f32 %v2386_v13, %v1180_v24  ;;  %v1166_v36 = vmul.f32 %v2390_v33, %v1126_v37  ;;  %v1280_v13 = vmax.f32 %v1216_v32, %v1272_v57 }
 0x6aa   :  { %v1284_v22 = vmax.f32 %v1220_v4, %v1276_v9  ;;  %v1246_v18 = vpop.permute.xlu1 %1245  ;;  %v1174_v35 = vsub.f32 0.0, %v1166_v36 }
 0x6ab   :  { %v1194_v30 = vpop.permute.xlu0 %1193  ;;  %v1269_v10 = vmul.f32 %v1246_v18, %v1173_v1 }
 0x6ac   :  { %v1215_v48 = vmul.f32 %v1194_v30, %v1175_v29  ;;  %v1580_v44 = vpack.i.bf16 %v1283_v26, %v1284_v22  ;;  %v1214_v19 = vmul.f32 %v1192_v63, %v1174_v35 }
 0x6ad   :  { %v1277_v42 = vmax.f32 %v1213_v31, %v1269_v10 }
 0x6ae   :  { %v1279_v27 = vmax.f32 %v1215_v48, %v1271_v25  ;;  %1581 = vrot.lane.b32.xlu0 %v1580_v44, %s1645_s3 }
 0x6b0   :  { %v1590_v56 = vpack.i.bf16 %v1279_v27, %v1280_v13 }
 0x6b2   :  { %1591 = vrot.lane.b32.xlu1 %v1590_v56, %s1645_s3 }
 0x6b3   :  { %v1248_v5 = vpop.permute.xlu0 %1247 }
 0x6b4   :  { %v1270_v3 = vmul.f32 %v1248_v5, %v1174_v35 }
 0x6b6   :  { %v1278_v28 = vmax.f32 %v1214_v19, %v1270_v3 }
 0x6b8   :  { %v1595_v2 = vpack.i.bf16 %v1277_v42, %v1278_v28 }
 0x6ba   :  { %1345 = vrot.lane.b32.xlu1 %v930_v16, %s1646_s17  ;;  %1596 = vrot.lane.b32.xlu0 %v1595_v2, %s1645_s3 }
 0x6ef   :  { %v1587_v40 = vpop.permute.xlu2 %1586 }
 0x6f0   :  { %v1588_v21 = vunpack.i.l.bf16 %v1587_v40  ;;  %v1589_v47 = vunpack.i.h.bf16 %v1587_v40 }
 0x6f7   :  { %v1341_v39 = vpop.permute.xlu2 %1340 }
 0x6ff   :  { %v1353_v53 = vpop.permute.xlu2 %1352 }
 0x720   :  { %v1582_v33 = vpop.permute.xlu0 %1581 }
 0x721   :  { %v1583_v17 = vunpack.i.l.bf16 %v1582_v33  ;;  %v1584_v51 = vunpack.i.h.bf16 %v1582_v33 }
 0x723   :  { %1325 = vmatpush.msra.mxu3 %v1583_v17 }
 0x724   :  { %v1592_v41 = vpop.permute.xlu1 %1591 }
 0x725   :  { %1326 = vmatpush.msra.mxu3 %v1584_v51  ;;  %v1593_v60 = vunpack.i.l.bf16 %v1592_v41  ;;  %v1594_v11 = vunpack.i.h.bf16 %v1592_v41 }
 0x727   :  { %1327 = vmatpush.msra.mxu3 %v1588_v21 }
 0x729   :  { %1328 = vmatpush.msra.mxu3 %v1589_v47 }
 0x72b   :  { %1329 = vmatpush.msra.mxu3 %v1593_v60 }
 0x72c   :  { %v1597_v61 = vpop.permute.xlu0 %1596  ;;  %v1346_v45 = vpop.permute.xlu1 %1345 }
 0x72d   :  { %v1598_v38 = vunpack.i.l.bf16 %v1597_v61  ;;  %1330 = vmatpush.msra.mxu3 %v1594_v11  ;;  %v1599_v16 = vunpack.i.h.bf16 %v1597_v61 }
 0x72f   :  { %1331 = vmatpush.msra.mxu3 %v1598_v38 }
 0x731   :  { %1332 = vmatpush.msra.mxu3 %v1599_v16 }
 0x732   :  { %1421 = vmatmul.msk.f32.vlgmr.msra.gmra.mxu3 %vm904_vm14, %v2273_v20 }
 0x7b5   :  { %v1334_v43 = vpop.f32.mrf.mxu3 }
 0x7b6   :  { %v1337_v46 = vmul.f32 0.0625, %v1334_v43 }
 0x7b8   :  { %v1343_v7 = vadd.f32 %v1341_v39, %v1337_v46  ;;  %1349 = vrot.lane.b32.xlu0 %v1337_v46, %s1633_s16 }
 0x7ba   :  { %1356 = vrot.lane.b32.xlu1 %v1343_v7, %s1648_s0 }
 0x82a   :  { %v1350_v50 = vpop.permute.xlu0 %1349 }
 0x82b   :  { %v1359_v6 = vsel %vm859_vm10, %v1346_v45, %v1350_v50 }
 0x82c   :  { %v1360_v59 = vsel %vm868_vm11, %v1359_v6, %v1353_v53  ;;  %v1357_v0 = vpop.permute.xlu1 %1356 }
 0x82d   :  { %v1361_v54 = vsel %vm877_vm12, %v1360_v59, %v1353_v53 }
 0x82e   :  { %v1362_v20 = vsel %vm346_vm1, %v1361_v54, %v1353_v53 }
 0x82f   :  { %v1363_v8 = vsel %vm894_vm13, %v1362_v20, %v1357_v0 }
 0x830   :  { %1365 = vst.msk [vmem:[%s2446_s10] sm:$0xf] %vm1364_vm7, %v1363_v8 }

</bundles_post_ra>
